<compile_context>
chip_gen: v7x
topology: tpu7x:2x2x1
jax: 0.10.0
libtpu: 0.0.40
codegen_flags: <defaults>
</compile_context>

<pallas_src>
import jax
import jax.numpy as jnp
import numpy as np
from jax.experimental import pallas as pl
from jax.experimental.pallas import tpu as pltpu

_LANE = 128


def _hardswish(x):
    # x * relu6(x + 3) / 6  (exact PyTorch Hardswish)
    return x * jnp.clip(x + 3.0, 0.0, 6.0) * (1.0 / 6.0)


def _round_up(v, m):
    return ((v + m - 1) // m) * m


def _pad_channels(c):
    # Lane padding for channel dims.  Real widths > 128 round to 256 so the
    # 1x1-conv matmul operands fill the 2x256x256 MXUs on v6e/v7x
    # (v5e's 128x128 MXU is indifferent; <=128 stays at one lane tile).
    return _LANE if c <= _LANE else _round_up(c, 2 * _LANE)


def _pad2(a, rows, cols):
    return jnp.pad(a, ((0, rows - a.shape[0]), (0, cols - a.shape[1])))


def _vmem_limit(block_bytes):
    # Raise the scoped-VMEM limit above the 16/32 MiB defaults so large
    # batch/strip tiles are admitted, keeping headroom below physical VMEM.
    try:
        cap = pltpu.get_tpu_info().vmem_capacity_bytes
    except Exception:
        cap = 64 * 1024 * 1024
    return int(min(cap * 7 // 8, max(32 * 1024 * 1024, 4 * block_bytes)))


def mobilenetv3_block_forward(x_nchw, p, *, stride, has_identity,
                              batch_tile=8, strip_rows=8):
    N, Cin, H, W = x_nchw.shape
    Cexp = p["w1"].shape[1]
    Cse = p["wse1"].shape[1]
    Cout = p["w3"].shape[1]
    if has_identity:
        assert stride == 1 and Cin == Cout, (
            "identity path requires stride == 1 and in_channels == out_channels")
    Ho = (H + 2 - 3) // stride + 1
    Wo = (W + 2 - 3) // stride + 1

    Cin_p = _pad_channels(Cin)
    Cexp_p = _pad_channels(Cexp)
    Cse_p = _pad_channels(Cse)
    Cout_p = _pad_channels(Cout)

    # ---- batch tile: >= 2 grid steps when N allows (v7x has 2 TensorCores).
    BT = max(1, min(batch_tile, N))
    if N >= 2:
        BT = min(BT, N // 2)
    while N % BT:
        BT -= 1

    # ---- H row-strip (1-row halo) so VMEM scales with the strip, not with H.
    if stride == 1:
        SH = max(1, min(strip_rows, H))
        while H % SH:
            SH -= 1
        n_strips = H // SH
        OHs = SH                       # output rows per strip
    else:
        SH, n_strips, OHs = H, 1, Ho   # single strip on the strided path

    inv_hw = 1.0 / float(Ho * Wo)

    # ---- NHWC bf16 input (halves the x DMA), channels padded to lane width.
    x = jnp.transpose(x_nchw, (0, 2, 3, 1)).astype(jnp.bfloat16)
    x = jnp.pad(x, ((0, 0), (0, 0), (0, 0), (0, Cin_p - Cin)))

    w1 = _pad2(p["w1"], Cin_p, Cexp_p).astype(jnp.bfloat16)
    s1 = _pad2(p["s1"], 1, Cexp_p)
    b1 = _pad2(p["b1"], 1, Cexp_p)
    wd = jnp.pad(p["wd"], ((0, 0), (0, 0), (0, Cexp_p - Cexp)))
    s2 = _pad2(p["s2"], 1, Cexp_p)
    b2 = _pad2(p["b2"], 1, Cexp_p)
    wse1 = _pad2(p["wse1"], Cexp_p, Cse_p).astype(jnp.bfloat16)
    bse1 = _pad2(p["bse1"], 1, Cse_p)
    wse2 = _pad2(p["wse2"], Cse_p, Cexp_p).astype(jnp.bfloat16)
    bse2 = _pad2(p["bse2"], 1, Cexp_p)
    w3 = _pad2(p["w3"], Cexp_p, Cout_p).astype(jnp.bfloat16)
    s3 = _pad2(p["s3"], 1, Cout_p)
    b3 = _pad2(p["b3"], 1, Cout_p)

    # ------------------------------------------------------------------ pass A
    def kernel_a(xu_ref, xm_ref, xd_ref, w1_ref, s1_ref, b1_ref,
                 wd_ref, s2_ref, b2_ref, dw_ref, pool_ref, pad_ref):
        s = pl.program_id(1)
        last = pl.num_programs(1) - 1

        # expansion 1x1 (MXU, bf16 in / f32 acc) on strip + 1-row halo
        xcat = jnp.concatenate([xu_ref[...], xm_ref[...], xd_ref[...]], axis=1)
        xe = jnp.dot(xcat.reshape(BT * (SH + 2) * W, Cin_p), w1_ref[...],
                     preferred_element_type=jnp.float32)
        xe = _hardswish(xe * s1_ref[...] + b1_ref[...])
        xe = xe.reshape(BT, SH + 2, W, Cexp_p)

        # halo scratch: only the borders are zeroed, interior fully overwritten
        pad_ref[:, :, 0:1, :] = jnp.zeros((BT, SH + 2, 1, Cexp_p), jnp.float32)
        pad_ref[:, :, W + 1:W + 2, :] = jnp.zeros((BT, SH + 2, 1, Cexp_p),
                                                  jnp.float32)
        pad_ref[:, :, 1:W + 1, :] = xe

        @pl.when(s == 0)
        def _():  # image top padding
            pad_ref[:, 0:1, :, :] = jnp.zeros((BT, 1, W + 2, Cexp_p),
                                              jnp.float32)

        @pl.when(s == last)
        def _():  # image bottom padding
            pad_ref[:, SH + 1:SH + 2, :, :] = jnp.zeros((BT, 1, W + 2, Cexp_p),
                                                        jnp.float32)

        # depthwise 3x3 (+ folded BN + hswish); accumulator seeded by tap (0,0)
        wd_full = wd_ref[...]                              # (3, 3, Cexp_p) f32
        acc = None
        for kh in range(3):
            for kw in range(3):
                if stride == 1:
                    win = pad_ref[:, kh:kh + SH, kw:kw + W, :]
                else:
                    win = pad_ref[:, pl.ds(kh, Ho, stride),
                                  pl.ds(kw, Wo, stride), :]
                term = win * wd_full[kh, kw].reshape(1, 1, 1, Cexp_p)
                acc = term if acc is None else acc + term
        dw = _hardswish(acc * s2_ref[...].reshape(1, 1, 1, Cexp_p)
                        + b2_ref[...].reshape(1, 1, 1, Cexp_p))
        dw_ref[...] = dw.astype(dw_ref.dtype)              # bf16 HBM writeback

        # SE squeeze: per-channel pooled sums accumulated across strips
        psum = jnp.sum(dw, axis=(1, 2)).reshape(BT, 1, Cexp_p)

        @pl.when(s == 0)
        def _():
            pool_ref[...] = jnp.zeros_like(pool_ref)

        pool_ref[...] += psum

    def const_spec(shape):
        zeros = (0,) * len(shape)
        return pl.BlockSpec(shape, lambda n, s, _z=zeros: _z)

    x_up_spec = pl.BlockSpec(
        (BT, 1, W, Cin_p), lambda n, s: (n, jnp.maximum(s * SH - 1, 0), 0, 0))
    x_mid_spec = pl.BlockSpec((BT, SH, W, Cin_p), lambda n, s: (n, s, 0, 0))
    x_dn_spec = pl.BlockSpec(
        (BT, 1, W, Cin_p),
        lambda n, s: (n, jnp.minimum(s * SH + SH, H - 1), 0, 0))

    blk_a = (3 * BT * (SH + 2) * W * Cin_p * 2
             + Cin_p * Cexp_p * 2 + 13 * Cexp_p * 4
             + BT * OHs * Wo * Cexp_p * 2 + BT * Cexp_p * 4
             + BT * (SH + 2) * (W + 2) * Cexp_p * 4)
    cost_a = pl.CostEstimate(
        flops=int(2 * N * (H + 2 * n_strips) * W * Cin_p * Cexp_p
                  + 18 * N * Ho * Wo * Cexp_p),
        transcendentals=0,
        bytes_accessed=int(N * (H + 2 * n_strips) * W * Cin_p * 2
                           + N * Ho * Wo * Cexp_p * 2 + N * Cexp_p * 4
                           + Cin_p * Cexp_p * 2 + 13 * Cexp_p * 4))

    dw_hbm, pooled = pl.pallas_call(
        kernel_a,
        out_shape=(jax.ShapeDtypeStruct((N, Ho, Wo, Cexp_p), jnp.bfloat16),
                   jax.ShapeDtypeStruct((N, 1, Cexp_p), jnp.float32)),
        grid_spec=pltpu.PrefetchScalarGridSpec(
            num_scalar_prefetch=0,
            grid=(N // BT, n_strips),
            in_specs=[x_up_spec, x_mid_spec, x_dn_spec,
                      const_spec((Cin_p, Cexp_p)),
                      const_spec((1, Cexp_p)), const_spec((1, Cexp_p)),
                      const_spec((3, 3, Cexp_p)),
                      const_spec((1, Cexp_p)), const_spec((1, Cexp_p))],
            out_specs=(pl.BlockSpec((BT, OHs, Wo, Cexp_p),
                                    lambda n, s: (n, s, 0, 0)),
                       pl.BlockSpec((BT, 1, Cexp_p), lambda n, s: (n, 0, 0))),
            scratch_shapes=[pltpu.VMEM((BT, SH + 2, W + 2, Cexp_p),
                                       jnp.float32)],
        ),
        compiler_params=pltpu.CompilerParams(
            dimension_semantics=("parallel", "arbitrary"),
            vmem_limit_bytes=_vmem_limit(blk_a)),
        cost_estimate=cost_a,
    )(x, x, x, w1, s1, b1, wd, s2, b2)

    # ------------------------------------------------------------------ pass B
    def kernel_b(dw_ref, pool_ref, *rest):
        if has_identity:
            (x_ref, wse1_ref, bse1_ref, wse2_ref, bse2_ref,
             w3_ref, s3_ref, b3_ref, o_ref) = rest
        else:
            (wse1_ref, bse1_ref, wse2_ref, bse2_ref,
             w3_ref, s3_ref, b3_ref, o_ref) = rest

        # SE excitation, vectorized over the batch tile (two tiny matmuls)
        pooled_v = pool_ref[...].reshape(BT, Cexp_p) * inv_hw
        hid = jnp.dot(pooled_v.astype(jnp.bfloat16), wse1_ref[...],
                      preferred_element_type=jnp.float32) + bse1_ref[...]
        hid = _hardswish(hid)
        exc = jnp.dot(hid.astype(jnp.bfloat16), wse2_ref[...],
                      preferred_element_type=jnp.float32) + bse2_ref[...]
        gate = jax.nn.sigmoid(exc).reshape(BT, 1, 1, Cexp_p)

        # channel gate + linear 1x1 (MXU) + folded BN (+ residual), bf16 store
        y = dw_ref[...].astype(jnp.float32) * gate
        out = jnp.dot(y.reshape(BT * OHs * Wo, Cexp_p).astype(jnp.bfloat16),
                      w3_ref[...], preferred_element_type=jnp.float32)
        out = (out * s3_ref[...] + b3_ref[...]).reshape(BT, OHs, Wo, Cout_p)
        if has_identity:
            out = out + x_ref[...].astype(jnp.float32)
        o_ref[...] = out.astype(o_ref.dtype)

    in_specs_b = [pl.BlockSpec((BT, OHs, Wo, Cexp_p), lambda n, s: (n, s, 0, 0)),
                  pl.BlockSpec((BT, 1, Cexp_p), lambda n, s: (n, 0, 0))]
    args_b = [dw_hbm, pooled]
    if has_identity:
        in_specs_b.append(pl.BlockSpec((BT, SH, W, Cin_p),
                                       lambda n, s: (n, s, 0, 0)))
        args_b.append(x)
    in_specs_b += [const_spec((Cexp_p, Cse_p)), const_spec((1, Cse_p)),
                   const_spec((Cse_p, Cexp_p)), const_spec((1, Cexp_p)),
                   const_spec((Cexp_p, Cout_p)),
                   const_spec((1, Cout_p)), const_spec((1, Cout_p))]
    args_b += [wse1, bse1, wse2, bse2, w3, s3, b3]

    blk_b = (BT * OHs * Wo * (Cexp_p + Cout_p) * 2
             + (BT * SH * W * Cin_p * 2 if has_identity else 0)
             + 2 * Cexp_p * Cse_p * 2 + Cexp_p * Cout_p * 2 + BT * Cexp_p * 4)
    cost_b = pl.CostEstimate(
        flops=int(2 * N * Ho * Wo * Cexp_p * Cout_p
                  + 4 * N * n_strips * Cexp_p * Cse_p),
        transcendentals=int(N * n_strips * Cexp_p),
        bytes_accessed=int(N * Ho * Wo * (Cexp_p + Cout_p) * 2
                           + (N * H * W * Cin_p * 2 if has_identity else 0)
                           + Cexp_p * (2 * Cse_p + Cout_p) * 2))

    out_nhwc = pl.pallas_call(
        kernel_b,
        out_shape=jax.ShapeDtypeStruct((N, Ho, Wo, Cout_p), jnp.bfloat16),
        grid_spec=pltpu.PrefetchScalarGridSpec(
            num_scalar_prefetch=0,
            grid=(N // BT, n_strips),
            in_specs=in_specs_b,
            out_specs=pl.BlockSpec((BT, OHs, Wo, Cout_p),
                                   lambda n, s: (n, s, 0, 0)),
        ),
        compiler_params=pltpu.CompilerParams(
            dimension_semantics=("parallel", "parallel"),
            vmem_limit_bytes=_vmem_limit(blk_b)),
        cost_estimate=cost_b,
    )(*args_b)

    # back to NCHW; output stays bf16 (next block's 1x1 conv consumes bf16).
    return jnp.transpose(out_nhwc[..., :Cout], (0, 3, 1, 2))


def ref_forward(x_nchw, p, *, stride, has_identity):
    """Pure-JAX reference mirroring the kernel's precision policy (bf16 matmul
    operands / bf16 dw intermediate & output, f32 accumulation elsewhere)."""
    x = jnp.transpose(x_nchw, (0, 2, 3, 1)).astype(jnp.bfloat16)
    N, H, W, Cin = x.shape
    Cexp = p["w1"].shape[1]
    Ho = (H + 2 - 3) // stride + 1
    Wo = (W + 2 - 3) // stride + 1

    xe = jnp.dot(x.reshape(-1, Cin), p["w1"].astype(jnp.bfloat16),
                 preferred_element_type=jnp.float32).reshape(N, H, W, Cexp)
    xe = _hardswish(xe * p["s1"] + p["b1"])

    xp = jnp.pad(xe, ((0, 0), (1, 1), (1, 1), (0, 0)))
    acc = None
    for kh in range(3):
        for kw in range(3):
            win = xp[:, kh:kh + (Ho - 1) * stride + 1:stride,
                     kw:kw + (Wo - 1) * stride + 1:stride, :]
            term = win * p["wd"][kh, kw]
            acc = term if acc is None else acc + term
    dw = _hardswish(acc * p["s2"] + p["b2"])

    pooled = jnp.sum(dw, axis=(1, 2)) * (1.0 / (Ho * Wo))
    hid = _hardswish(jnp.dot(pooled.astype(jnp.bfloat16),
                             p["wse1"].astype(jnp.bfloat16),
                             preferred_element_type=jnp.float32) + p["bse1"])
    gate = jax.nn.sigmoid(jnp.dot(hid.astype(jnp.bfloat16),
                                  p["wse2"].astype(jnp.bfloat16),
                                  preferred_element_type=jnp.float32)
                          + p["bse2"])

    y = dw.astype(jnp.bfloat16).astype(jnp.float32) * gate[:, None, None, :]
    out = jnp.dot(y.reshape(-1, Cexp).astype(jnp.bfloat16),
                  p["w3"].astype(jnp.bfloat16),
                  preferred_element_type=jnp.float32)
    out = out.reshape(N, Ho, Wo, -1) * p["s3"] + p["b3"]
    if has_identity:
        out = out + x.astype(jnp.float32)
    out = out.astype(jnp.bfloat16)
    return jnp.transpose(out, (0, 3, 1, 2))


def init_params(key, in_channels, out_channels, exp_ratio, se_ratio, width=1.0):
    Cexp = int(in_channels * exp_ratio * width)
    Cse = int(in_channels * se_ratio * width)
    ks = jax.random.split(key, 19)

    def bn_fold(kg, kb, km, kv, C):
        gamma = jax.random.uniform(kg, (1, C), jnp.float32, 0.5, 1.5)
        beta = 0.1 * jax.random.normal(kb, (1, C), jnp.float32)
        mean = 0.1 * jax.random.normal(km, (1, C), jnp.float32)
        var = jax.random.uniform(kv, (1, C), jnp.float32, 0.5, 1.5)
        scale = gamma / jnp.sqrt(var + 1e-5)
        return scale, beta - mean * scale

    s1, b1 = bn_fold(ks[0], ks[1], ks[2], ks[3], Cexp)
    s2, b2 = bn_fold(ks[4], ks[5], ks[6], ks[7], Cexp)
    s3, b3 = bn_fold(ks[8], ks[9], ks[10], ks[11], out_channels)
    return {
        "w1": 0.1 * jax.random.normal(ks[12], (in_channels, Cexp), jnp.float32),
        "s1": s1, "b1": b1,
        "wd": 0.1 * jax.random.normal(ks[13], (3, 3, Cexp), jnp.float32),
        "s2": s2, "b2": b2,
        "wse1": 0.1 * jax.random.normal(ks[14], (Cexp, Cse), jnp.float32),
        "bse1": 0.1 * jax.random.normal(ks[15], (1, Cse), jnp.float32),
        "wse2": 0.1 * jax.random.normal(ks[16], (Cse, Cexp), jnp.float32),
        "bse2": 0.1 * jax.random.normal(ks[17], (1, Cexp), jnp.float32),
        "w3": 0.1 * jax.random.normal(ks[18], (Cexp, out_channels), jnp.float32),
        "s3": s3, "b3": b3,
    }


if __name__ == "__main__":
    key = jax.random.PRNGKey(0)
    kx, kp = jax.random.split(key)

    # small shapes consistent with the module (stride-1 block with identity)
    N, Cin, H, W = 2, 8, 16, 16
    Cout, stride, exp_ratio, se_ratio = 8, 1, 3.0, 0.25

    x = jax.random.normal(kx, (N, Cin, H, W), jnp.float32)
    params = init_params(kp, Cin, Cout, exp_ratio, se_ratio)
    has_identity = (stride == 1 and Cin == Cout)

    out = mobilenetv3_block_forward(x, params, stride=stride,
                                    has_identity=has_identity)
    out = jax.block_until_ready(out)

    ref = ref_forward(x, params, stride=stride, has_identity=has_identity)
    np.testing.assert_allclose(np.asarray(out.astype(jnp.float32)),
                               np.asarray(ref.astype(jnp.float32)),
                               rtol=2e-2, atol=2e-2)
    print("KERNEL_OK")
</pallas_src>

<mosaic_0001>
module attributes {stable_mosaic.version = 11 : i64} {
  func.func @kernel_a(%arg0: i32, %arg1: i32, %arg2: memref<1x1x16x128xbf16, #tpu.memory_space<vmem>>, %arg3: memref<1x8x16x128xbf16, #tpu.memory_space<vmem>>, %arg4: memref<1x1x16x128xbf16, #tpu.memory_space<vmem>>, %arg5: memref<128x128xbf16, #tpu.memory_space<vmem>>, %arg6: memref<1x128xf32, #tpu.memory_space<vmem>>, %arg7: memref<1x128xf32, #tpu.memory_space<vmem>>, %arg8: memref<3x3x128xf32, #tpu.memory_space<vmem>>, %arg9: memref<1x128xf32, #tpu.memory_space<vmem>>, %arg10: memref<1x128xf32, #tpu.memory_space<vmem>>, %arg11: memref<1x8x16x128xbf16, #tpu.memory_space<vmem>>, %arg12: memref<1x1x128xf32, #tpu.memory_space<vmem>>, %arg13: memref<1x10x18x128xf32, #tpu.memory_space<vmem>>) attributes {dimension_semantics = [#tpu.dimension_semantics<parallel>, #tpu.dimension_semantics<arbitrary>], iteration_bounds = array<i64: 2, 2>, scalar_prefetch = 0 : i64, scratch_operands = 1 : i64, tpu.core_type = #tpu.core_type<tc>, window_params = [{transform_indices = @transform_0, window_bounds = array<i64: 1, 1, 16, 128>}, {transform_indices = @transform_1, window_bounds = array<i64: 1, 8, 16, 128>}, {transform_indices = @transform_2, window_bounds = array<i64: 1, 1, 16, 128>}, {pipeline_mode = #tpu.pipeline_mode<synchronous>, transform_indices = @transform_3, window_bounds = array<i64: 128, 128>}, {pipeline_mode = #tpu.pipeline_mode<synchronous>, transform_indices = @transform_4, window_bounds = array<i64: 1, 128>}, {pipeline_mode = #tpu.pipeline_mode<synchronous>, transform_indices = @transform_5, window_bounds = array<i64: 1, 128>}, {pipeline_mode = #tpu.pipeline_mode<synchronous>, transform_indices = @transform_6, window_bounds = array<i64: 3, 3, 128>}, {pipeline_mode = #tpu.pipeline_mode<synchronous>, transform_indices = @transform_7, window_bounds = array<i64: 1, 128>}, {pipeline_mode = #tpu.pipeline_mode<synchronous>, transform_indices = @transform_8, window_bounds = array<i64: 1, 128>}, {transform_indices = @transform_9, window_bounds = array<i64: 1, 8, 16, 128>}, {transform_indices = @transform_10, window_bounds = array<i64: 1, 1, 128>}]} {
    %c0 = arith.constant 0 : index
    %c0_0 = arith.constant 0 : index
    %c0_1 = arith.constant 0 : index
    %c0_2 = arith.constant 0 : index
    %0 = vector.load %arg2[%c0, %c0_0, %c0_1, %c0_2] : memref<1x1x16x128xbf16, #tpu.memory_space<vmem>>, vector<1x1x16x128xbf16>
    %c0_3 = arith.constant 0 : index
    %c0_4 = arith.constant 0 : index
    %c0_5 = arith.constant 0 : index
    %c0_6 = arith.constant 0 : index
    %1 = vector.load %arg3[%c0_3, %c0_4, %c0_5, %c0_6] : memref<1x8x16x128xbf16, #tpu.memory_space<vmem>>, vector<1x8x16x128xbf16>
    %c0_7 = arith.constant 0 : index
    %c0_8 = arith.constant 0 : index
    %c0_9 = arith.constant 0 : index
    %c0_10 = arith.constant 0 : index
    %2 = vector.load %arg4[%c0_7, %c0_8, %c0_9, %c0_10] : memref<1x1x16x128xbf16, #tpu.memory_space<vmem>>, vector<1x1x16x128xbf16>
    %3 = tpu.concatenate %0, %1, %2 in 1 : vector<1x1x16x128xbf16>, vector<1x8x16x128xbf16>, vector<1x1x16x128xbf16> -> vector<1x10x16x128xbf16>
    %4 = vector.shape_cast %3 : vector<1x10x16x128xbf16> to vector<160x128xbf16>
    %c0_11 = arith.constant 0 : index
    %c0_12 = arith.constant 0 : index
    %5 = vector.load %arg5[%c0_11, %c0_12] : memref<128x128xbf16, #tpu.memory_space<vmem>>, vector<128x128xbf16>
    %cst = arith.constant dense<0.000000e+00> : vector<160x128xf32>
    %6 = tpu.matmul %4, %5, %cst {dimension_numbers = #tpu.dot_dimension_numbers<[1], [0], [0], [1], [0, 0, 1, 1], [], []>} : vector<160x128xbf16>, vector<128x128xbf16>, vector<160x128xf32> -> vector<160x128xf32>
    %c0_13 = arith.constant 0 : index
    %c0_14 = arith.constant 0 : index
    %7 = vector.load %arg6[%c0_13, %c0_14] : memref<1x128xf32, #tpu.memory_space<vmem>>, vector<1x128xf32>
    %8 = vector.broadcast %7 : vector<1x128xf32> to vector<160x128xf32>
    %9 = arith.mulf %6, %8 : vector<160x128xf32>
    %c0_15 = arith.constant 0 : index
    %c0_16 = arith.constant 0 : index
    %10 = vector.load %arg7[%c0_15, %c0_16] : memref<1x128xf32, #tpu.memory_space<vmem>>, vector<1x128xf32>
    %11 = vector.broadcast %10 : vector<1x128xf32> to vector<160x128xf32>
    %12 = arith.addf %9, %11 : vector<160x128xf32>
    %cst_17 = arith.constant 3.000000e+00 : f32
    %13 = vector.broadcast %cst_17 : f32 to vector<160x128xf32>
    %14 = arith.addf %12, %13 : vector<160x128xf32>
    %cst_18 = arith.constant 0.000000e+00 : f32
    %cst_19 = arith.constant 6.000000e+00 : f32
    %15 = vector.broadcast %cst_18 : f32 to vector<160x128xf32>
    %16 = arith.maximumf %15, %14 : vector<160x128xf32>
    %17 = vector.broadcast %cst_19 : f32 to vector<160x128xf32>
    %18 = arith.minimumf %17, %16 : vector<160x128xf32>
    %19 = arith.mulf %12, %18 : vector<160x128xf32>
    %cst_20 = arith.constant 0.166666672 : f32
    %20 = vector.broadcast %cst_20 : f32 to vector<160x128xf32>
    %21 = arith.mulf %19, %20 : vector<160x128xf32>
    %22 = vector.shape_cast %21 : vector<160x128xf32> to vector<1x10x16x128xf32>
    %cst_21 = arith.constant 0.000000e+00 : f32
    %23 = vector.broadcast %cst_21 : f32 to vector<1x10x1x128xf32>
    %c0_22 = arith.constant 0 : index
    %c0_23 = arith.constant 0 : index
    %c0_24 = arith.constant 0 : index
    %c0_25 = arith.constant 0 : index
    %24 = vector.load %arg13[%c0_22, %c0_23, %c0_24, %c0_25] : memref<1x10x18x128xf32, #tpu.memory_space<vmem>>, vector<1x10x1x128xf32>
    tpu.vector_store %arg13[%c0_22, %c0_23, %c0_24, %c0_25], %23 {strides = array<i32>} : memref<1x10x18x128xf32, #tpu.memory_space<vmem>>, vector<1x10x1x128xf32>,
    %cst_26 = arith.constant 0.000000e+00 : f32
    %25 = vector.broadcast %cst_26 : f32 to vector<1x10x1x128xf32>
    %c0_27 = arith.constant 0 : index
    %c0_28 = arith.constant 0 : index
    %c17 = arith.constant 17 : index
    %c0_29 = arith.constant 0 : index
    %26 = vector.load %arg13[%c0_27, %c0_28, %c17, %c0_29] : memref<1x10x18x128xf32, #tpu.memory_space<vmem>>, vector<1x10x1x128xf32>
    tpu.vector_store %arg13[%c0_27, %c0_28, %c17, %c0_29], %25 {strides = array<i32>} : memref<1x10x18x128xf32, #tpu.memory_space<vmem>>, vector<1x10x1x128xf32>,
    %c0_30 = arith.constant 0 : index
    %c0_31 = arith.constant 0 : index
    %c1 = arith.constant 1 : index
    %c0_32 = arith.constant 0 : index
    %27 = vector.load %arg13[%c0_30, %c0_31, %c1, %c0_32] : memref<1x10x18x128xf32, #tpu.memory_space<vmem>>, vector<1x10x16x128xf32>
    tpu.vector_store %arg13[%c0_30, %c0_31, %c1, %c0_32], %22 {strides = array<i32>} : memref<1x10x18x128xf32, #tpu.memory_space<vmem>>, vector<1x10x16x128xf32>,
    %c0_i32 = arith.constant 0 : i32
    %28 = arith.cmpi eq, %arg1, %c0_i32 : i32
    %29 = arith.extui %28 : i1 to i32
    %c0_i32_33 = arith.constant 0 : i32
    %30 = arith.cmpi ne, %29, %c0_i32_33 : i32
    scf.if %30 {
      %cst_94 = arith.constant 0.000000e+00 : f32
      %124 = vector.broadcast %cst_94 : f32 to vector<1x1x18x128xf32>
      %c0_95 = arith.constant 0 : index
      %c0_96 = arith.constant 0 : index
      %c0_97 = arith.constant 0 : index
      %c0_98 = arith.constant 0 : index
      %125 = vector.load %arg13[%c0_95, %c0_96, %c0_97, %c0_98] : memref<1x10x18x128xf32, #tpu.memory_space<vmem>>, vector<1x1x18x128xf32>
      tpu.vector_store %arg13[%c0_95, %c0_96, %c0_97, %c0_98], %124 {strides = array<i32>} : memref<1x10x18x128xf32, #tpu.memory_space<vmem>>, vector<1x1x18x128xf32>,
    } else {
    }
    %c1_i32 = arith.constant 1 : i32
    %31 = arith.cmpi eq, %arg1, %c1_i32 : i32
    %32 = arith.extui %31 : i1 to i32
    %c0_i32_34 = arith.constant 0 : i32
    %33 = arith.cmpi ne, %32, %c0_i32_34 : i32
    scf.if %33 {
      %cst_94 = arith.constant 0.000000e+00 : f32
      %124 = vector.broadcast %cst_94 : f32 to vector<1x1x18x128xf32>
      %c0_95 = arith.constant 0 : index
      %c9 = arith.constant 9 : index
      %c0_96 = arith.constant 0 : index
      %c0_97 = arith.constant 0 : index
      %125 = vector.load %arg13[%c0_95, %c9, %c0_96, %c0_97] : memref<1x10x18x128xf32, #tpu.memory_space<vmem>>, vector<1x1x18x128xf32>
      tpu.vector_store %arg13[%c0_95, %c9, %c0_96, %c0_97], %124 {strides = array<i32>} : memref<1x10x18x128xf32, #tpu.memory_space<vmem>>, vector<1x1x18x128xf32>,
    } else {
    }
    %c0_35 = arith.constant 0 : index
    %c0_36 = arith.constant 0 : index
    %c0_37 = arith.constant 0 : index
    %34 = vector.load %arg8[%c0_35, %c0_36, %c0_37] : memref<3x3x128xf32, #tpu.memory_space<vmem>>, vector<3x3x128xf32>
    %c0_38 = arith.constant 0 : index
    %c0_39 = arith.constant 0 : index
    %c0_40 = arith.constant 0 : index
    %c0_41 = arith.constant 0 : index
    %35 = vector.load %arg13[%c0_38, %c0_39, %c0_40, %c0_41] : memref<1x10x18x128xf32, #tpu.memory_space<vmem>>, vector<1x8x16x128xf32>
    %36 = vector.extract_strided_slice %34 {offsets = [0, 0, 0], sizes = [1, 1, 128], strides = [1, 1, 1]} : vector<3x3x128xf32> to vector<1x1x128xf32>
    %37 = vector.shape_cast %36 : vector<1x1x128xf32> to vector<128xf32>
    %38 = vector.shape_cast %37 : vector<128xf32> to vector<1x1x1x128xf32>
    %39 = vector.broadcast %38 : vector<1x1x1x128xf32> to vector<1x8x16x128xf32>
    %40 = arith.mulf %35, %39 : vector<1x8x16x128xf32>
    %c0_42 = arith.constant 0 : index
    %c0_43 = arith.constant 0 : index
    %c1_44 = arith.constant 1 : index
    %c0_45 = arith.constant 0 : index
    %41 = vector.load %arg13[%c0_42, %c0_43, %c1_44, %c0_45] : memref<1x10x18x128xf32, #tpu.memory_space<vmem>>, vector<1x8x16x128xf32>
    %42 = vector.extract_strided_slice %34 {offsets = [0, 1, 0], sizes = [1, 1, 128], strides = [1, 1, 1]} : vector<3x3x128xf32> to vector<1x1x128xf32>
    %43 = vector.shape_cast %42 : vector<1x1x128xf32> to vector<128xf32>
    %44 = vector.shape_cast %43 : vector<128xf32> to vector<1x1x1x128xf32>
    %45 = vector.broadcast %44 : vector<1x1x1x128xf32> to vector<1x8x16x128xf32>
    %46 = arith.mulf %41, %45 : vector<1x8x16x128xf32>
    %47 = arith.addf %40, %46 : vector<1x8x16x128xf32>
    %c0_46 = arith.constant 0 : index
    %c0_47 = arith.constant 0 : index
    %c2 = arith.constant 2 : index
    %c0_48 = arith.constant 0 : index
    %48 = vector.load %arg13[%c0_46, %c0_47, %c2, %c0_48] : memref<1x10x18x128xf32, #tpu.memory_space<vmem>>, vector<1x8x16x128xf32>
    %49 = vector.extract_strided_slice %34 {offsets = [0, 2, 0], sizes = [1, 1, 128], strides = [1, 1, 1]} : vector<3x3x128xf32> to vector<1x1x128xf32>
    %50 = vector.shape_cast %49 : vector<1x1x128xf32> to vector<128xf32>
    %51 = vector.shape_cast %50 : vector<128xf32> to vector<1x1x1x128xf32>
    %52 = vector.broadcast %51 : vector<1x1x1x128xf32> to vector<1x8x16x128xf32>
    %53 = arith.mulf %48, %52 : vector<1x8x16x128xf32>
    %54 = arith.addf %47, %53 : vector<1x8x16x128xf32>
    %c0_49 = arith.constant 0 : index
    %c1_50 = arith.constant 1 : index
    %c0_51 = arith.constant 0 : index
    %c0_52 = arith.constant 0 : index
    %55 = vector.load %arg13[%c0_49, %c1_50, %c0_51, %c0_52] : memref<1x10x18x128xf32, #tpu.memory_space<vmem>>, vector<1x8x16x128xf32>
    %56 = vector.extract_strided_slice %34 {offsets = [1, 0, 0], sizes = [1, 1, 128], strides = [1, 1, 1]} : vector<3x3x128xf32> to vector<1x1x128xf32>
    %57 = vector.shape_cast %56 : vector<1x1x128xf32> to vector<128xf32>
    %58 = vector.shape_cast %57 : vector<128xf32> to vector<1x1x1x128xf32>
    %59 = vector.broadcast %58 : vector<1x1x1x128xf32> to vector<1x8x16x128xf32>
    %60 = arith.mulf %55, %59 : vector<1x8x16x128xf32>
    %61 = arith.addf %54, %60 : vector<1x8x16x128xf32>
    %c0_53 = arith.constant 0 : index
    %c1_54 = arith.constant 1 : index
    %c1_55 = arith.constant 1 : index
    %c0_56 = arith.constant 0 : index
    %62 = vector.load %arg13[%c0_53, %c1_54, %c1_55, %c0_56] : memref<1x10x18x128xf32, #tpu.memory_space<vmem>>, vector<1x8x16x128xf32>
    %63 = vector.extract_strided_slice %34 {offsets = [1, 1, 0], sizes = [1, 1, 128], strides = [1, 1, 1]} : vector<3x3x128xf32> to vector<1x1x128xf32>
    %64 = vector.shape_cast %63 : vector<1x1x128xf32> to vector<128xf32>
    %65 = vector.shape_cast %64 : vector<128xf32> to vector<1x1x1x128xf32>
    %66 = vector.broadcast %65 : vector<1x1x1x128xf32> to vector<1x8x16x128xf32>
    %67 = arith.mulf %62, %66 : vector<1x8x16x128xf32>
    %68 = arith.addf %61, %67 : vector<1x8x16x128xf32>
    %c0_57 = arith.constant 0 : index
    %c1_58 = arith.constant 1 : index
    %c2_59 = arith.constant 2 : index
    %c0_60 = arith.constant 0 : index
    %69 = vector.load %arg13[%c0_57, %c1_58, %c2_59, %c0_60] : memref<1x10x18x128xf32, #tpu.memory_space<vmem>>, vector<1x8x16x128xf32>
    %70 = vector.extract_strided_slice %34 {offsets = [1, 2, 0], sizes = [1, 1, 128], strides = [1, 1, 1]} : vector<3x3x128xf32> to vector<1x1x128xf32>
    %71 = vector.shape_cast %70 : vector<1x1x128xf32> to vector<128xf32>
    %72 = vector.shape_cast %71 : vector<128xf32> to vector<1x1x1x128xf32>
    %73 = vector.broadcast %72 : vector<1x1x1x128xf32> to vector<1x8x16x128xf32>
    %74 = arith.mulf %69, %73 : vector<1x8x16x128xf32>
    %75 = arith.addf %68, %74 : vector<1x8x16x128xf32>
    %c0_61 = arith.constant 0 : index
    %c2_62 = arith.constant 2 : index
    %c0_63 = arith.constant 0 : index
    %c0_64 = arith.constant 0 : index
    %76 = vector.load %arg13[%c0_61, %c2_62, %c0_63, %c0_64] : memref<1x10x18x128xf32, #tpu.memory_space<vmem>>, vector<1x8x16x128xf32>
    %77 = vector.extract_strided_slice %34 {offsets = [2, 0, 0], sizes = [1, 1, 128], strides = [1, 1, 1]} : vector<3x3x128xf32> to vector<1x1x128xf32>
    %78 = vector.shape_cast %77 : vector<1x1x128xf32> to vector<128xf32>
    %79 = vector.shape_cast %78 : vector<128xf32> to vector<1x1x1x128xf32>
    %80 = vector.broadcast %79 : vector<1x1x1x128xf32> to vector<1x8x16x128xf32>
    %81 = arith.mulf %76, %80 : vector<1x8x16x128xf32>
    %82 = arith.addf %75, %81 : vector<1x8x16x128xf32>
    %c0_65 = arith.constant 0 : index
    %c2_66 = arith.constant 2 : index
    %c1_67 = arith.constant 1 : index
    %c0_68 = arith.constant 0 : index
    %83 = vector.load %arg13[%c0_65, %c2_66, %c1_67, %c0_68] : memref<1x10x18x128xf32, #tpu.memory_space<vmem>>, vector<1x8x16x128xf32>
    %84 = vector.extract_strided_slice %34 {offsets = [2, 1, 0], sizes = [1, 1, 128], strides = [1, 1, 1]} : vector<3x3x128xf32> to vector<1x1x128xf32>
    %85 = vector.shape_cast %84 : vector<1x1x128xf32> to vector<128xf32>
    %86 = vector.shape_cast %85 : vector<128xf32> to vector<1x1x1x128xf32>
    %87 = vector.broadcast %86 : vector<1x1x1x128xf32> to vector<1x8x16x128xf32>
    %88 = arith.mulf %83, %87 : vector<1x8x16x128xf32>
    %89 = arith.addf %82, %88 : vector<1x8x16x128xf32>
    %c0_69 = arith.constant 0 : index
    %c2_70 = arith.constant 2 : index
    %c2_71 = arith.constant 2 : index
    %c0_72 = arith.constant 0 : index
    %90 = vector.load %arg13[%c0_69, %c2_70, %c2_71, %c0_72] : memref<1x10x18x128xf32, #tpu.memory_space<vmem>>, vector<1x8x16x128xf32>
    %91 = vector.extract_strided_slice %34 {offsets = [2, 2, 0], sizes = [1, 1, 128], strides = [1, 1, 1]} : vector<3x3x128xf32> to vector<1x1x128xf32>
    %92 = vector.shape_cast %91 : vector<1x1x128xf32> to vector<128xf32>
    %93 = vector.shape_cast %92 : vector<128xf32> to vector<1x1x1x128xf32>
    %94 = vector.broadcast %93 : vector<1x1x1x128xf32> to vector<1x8x16x128xf32>
    %95 = arith.mulf %90, %94 : vector<1x8x16x128xf32>
    %96 = arith.addf %89, %95 : vector<1x8x16x128xf32>
    %c0_73 = arith.constant 0 : index
    %c0_74 = arith.constant 0 : index
    %97 = vector.load %arg9[%c0_73, %c0_74] : memref<1x128xf32, #tpu.memory_space<vmem>>, vector<1x128xf32>
    %98 = vector.shape_cast %97 : vector<1x128xf32> to vector<1x1x1x128xf32>
    %99 = vector.broadcast %98 : vector<1x1x1x128xf32> to vector<1x8x16x128xf32>
    %100 = arith.mulf %96, %99 : vector<1x8x16x128xf32>
    %c0_75 = arith.constant 0 : index
    %c0_76 = arith.constant 0 : index
    %101 = vector.load %arg10[%c0_75, %c0_76] : memref<1x128xf32, #tpu.memory_space<vmem>>, vector<1x128xf32>
    %102 = vector.shape_cast %101 : vector<1x128xf32> to vector<1x1x1x128xf32>
    %103 = vector.broadcast %102 : vector<1x1x1x128xf32> to vector<1x8x16x128xf32>
    %104 = arith.addf %100, %103 : vector<1x8x16x128xf32>
    %cst_77 = arith.constant 3.000000e+00 : f32
    %105 = vector.broadcast %cst_77 : f32 to vector<1x8x16x128xf32>
    %106 = arith.addf %104, %105 : vector<1x8x16x128xf32>
    %cst_78 = arith.constant 0.000000e+00 : f32
    %cst_79 = arith.constant 6.000000e+00 : f32
    %107 = vector.broadcast %cst_78 : f32 to vector<1x8x16x128xf32>
    %108 = arith.maximumf %107, %106 : vector<1x8x16x128xf32>
    %109 = vector.broadcast %cst_79 : f32 to vector<1x8x16x128xf32>
    %110 = arith.minimumf %109, %108 : vector<1x8x16x128xf32>
    %111 = arith.mulf %104, %110 : vector<1x8x16x128xf32>
    %cst_80 = arith.constant 0.166666672 : f32
    %112 = vector.broadcast %cst_80 : f32 to vector<1x8x16x128xf32>
    %113 = arith.mulf %111, %112 : vector<1x8x16x128xf32>
    %114 = arith.truncf %113 : vector<1x8x16x128xf32> to vector<1x8x16x128xbf16>
    %c0_81 = arith.constant 0 : index
    %c0_82 = arith.constant 0 : index
    %c0_83 = arith.constant 0 : index
    %c0_84 = arith.constant 0 : index
    %115 = vector.load %arg11[%c0_81, %c0_82, %c0_83, %c0_84] : memref<1x8x16x128xbf16, #tpu.memory_space<vmem>>, vector<1x8x16x128xbf16>
    tpu.vector_store %arg11[%c0_81, %c0_82, %c0_83, %c0_84], %114 {strides = array<i32>} : memref<1x8x16x128xbf16, #tpu.memory_space<vmem>>, vector<1x8x16x128xbf16>,
    %cst_85 = arith.constant dense<0.000000e+00> : vector<1x128xf32>
    %116 = vector.multi_reduction <add>, %113, %cst_85 [1, 2] : vector<1x8x16x128xf32> to vector<1x128xf32>
    %117 = vector.shape_cast %116 : vector<1x128xf32> to vector<1x1x128xf32>
    %c0_i32_86 = arith.constant 0 : i32
    %118 = arith.cmpi eq, %arg1, %c0_i32_86 : i32
    %119 = arith.extui %118 : i1 to i32
    %c0_i32_87 = arith.constant 0 : i32
    %120 = arith.cmpi ne, %119, %c0_i32_87 : i32
    scf.if %120 {
      %cst_94 = arith.constant 0.000000e+00 : f32
      %124 = vector.broadcast %cst_94 : f32 to vector<1x1x128xf32>
      %c0_95 = arith.constant 0 : index
      %c0_96 = arith.constant 0 : index
      %c0_97 = arith.constant 0 : index
      %125 = vector.load %arg12[%c0_95, %c0_96, %c0_97] : memref<1x1x128xf32, #tpu.memory_space<vmem>>, vector<1x1x128xf32>
      tpu.vector_store %arg12[%c0_95, %c0_96, %c0_97], %124 {strides = array<i32>} : memref<1x1x128xf32, #tpu.memory_space<vmem>>, vector<1x1x128xf32>,
    } else {
    }
    %c0_88 = arith.constant 0 : index
    %c0_89 = arith.constant 0 : index
    %c0_90 = arith.constant 0 : index
    %121 = vector.load %arg12[%c0_88, %c0_89, %c0_90] : memref<1x1x128xf32, #tpu.memory_space<vmem>>, vector<1x1x128xf32>
    %122 = arith.addf %121, %117 : vector<1x1x128xf32>
    %c0_91 = arith.constant 0 : index
    %c0_92 = arith.constant 0 : index
    %c0_93 = arith.constant 0 : index
    %123 = vector.load %arg12[%c0_91, %c0_92, %c0_93] : memref<1x1x128xf32, #tpu.memory_space<vmem>>, vector<1x1x128xf32>
    tpu.vector_store %arg12[%c0_91, %c0_92, %c0_93], %122 {strides = array<i32>} : memref<1x1x128xf32, #tpu.memory_space<vmem>>, vector<1x1x128xf32>,
    return
  }
  func.func @transform_0(%arg0: i32, %arg1: i32) -> (i32, i32, i32, i32) {
    %c8_i32 = arith.constant 8 : i32
    %0 = arith.muli %arg1, %c8_i32 : i32
    %c1_i32 = arith.constant 1 : i32
    %1 = arith.subi %0, %c1_i32 : i32
    %c0_i32 = arith.constant 0 : i32
    %2 = arith.maxsi %1, %c0_i32 : i32
    %c0_i32_0 = arith.constant 0 : i32
    %c0_i32_1 = arith.constant 0 : i32
    %c0_i32_2 = arith.constant 0 : i32
    return %arg0, %2, %c0_i32_0, %c0_i32_1 : i32, i32, i32, i32
  }
  func.func @transform_1(%arg0: i32, %arg1: i32) -> (i32, i32, i32, i32) {
    %c0_i32 = arith.constant 0 : i32
    %c0_i32_0 = arith.constant 0 : i32
    %c0_i32_1 = arith.constant 0 : i32
    return %arg0, %arg1, %c0_i32, %c0_i32_0 : i32, i32, i32, i32
  }
  func.func @transform_2(%arg0: i32, %arg1: i32) -> (i32, i32, i32, i32) {
    %c8_i32 = arith.constant 8 : i32
    %0 = arith.muli %arg1, %c8_i32 : i32
    %c8_i32_0 = arith.constant 8 : i32
    %1 = arith.addi %0, %c8_i32_0 : i32
    %c15_i32 = arith.constant 15 : i32
    %2 = arith.minsi %1, %c15_i32 : i32
    %c0_i32 = arith.constant 0 : i32
    %c0_i32_1 = arith.constant 0 : i32
    %c0_i32_2 = arith.constant 0 : i32
    return %arg0, %2, %c0_i32, %c0_i32_1 : i32, i32, i32, i32
  }
  func.func @transform_3(%arg0: i32, %arg1: i32) -> (i32, i32) {
    %c0_i32 = arith.constant 0 : i32
    %c0_i32_0 = arith.constant 0 : i32
    %c0_i32_1 = arith.constant 0 : i32
    return %c0_i32, %c0_i32_0 : i32, i32
  }
  func.func @transform_4(%arg0: i32, %arg1: i32) -> (i32, i32) {
    %c0_i32 = arith.constant 0 : i32
    %c0_i32_0 = arith.constant 0 : i32
    %c0_i32_1 = arith.constant 0 : i32
    return %c0_i32, %c0_i32_0 : i32, i32
  }
  func.func @transform_5(%arg0: i32, %arg1: i32) -> (i32, i32) {
    %c0_i32 = arith.constant 0 : i32
    %c0_i32_0 = arith.constant 0 : i32
    %c0_i32_1 = arith.constant 0 : i32
    return %c0_i32, %c0_i32_0 : i32, i32
  }
  func.func @transform_6(%arg0: i32, %arg1: i32) -> (i32, i32, i32) {
    %c0_i32 = arith.constant 0 : i32
    %c0_i32_0 = arith.constant 0 : i32
    %c0_i32_1 = arith.constant 0 : i32
    %c0_i32_2 = arith.constant 0 : i32
    return %c0_i32, %c0_i32_0, %c0_i32_1 : i32, i32, i32
  }
  func.func @transform_7(%arg0: i32, %arg1: i32) -> (i32, i32) {
    %c0_i32 = arith.constant 0 : i32
    %c0_i32_0 = arith.constant 0 : i32
    %c0_i32_1 = arith.constant 0 : i32
    return %c0_i32, %c0_i32_0 : i32, i32
  }
  func.func @transform_8(%arg0: i32, %arg1: i32) -> (i32, i32) {
    %c0_i32 = arith.constant 0 : i32
    %c0_i32_0 = arith.constant 0 : i32
    %c0_i32_1 = arith.constant 0 : i32
    return %c0_i32, %c0_i32_0 : i32, i32
  }
  func.func @transform_9(%arg0: i32, %arg1: i32) -> (i32, i32, i32, i32) {
    %c0_i32 = arith.constant 0 : i32
    %c0_i32_0 = arith.constant 0 : i32
    %c0_i32_1 = arith.constant 0 : i32
    return %arg0, %arg1, %c0_i32, %c0_i32_0 : i32, i32, i32, i32
  }
  func.func @transform_10(%arg0: i32, %arg1: i32) -> (i32, i32, i32) {
    %c0_i32 = arith.constant 0 : i32
    %c0_i32_0 = arith.constant 0 : i32
    %c0_i32_1 = arith.constant 0 : i32
    return %arg0, %c0_i32, %c0_i32_0 : i32, i32, i32
  }
}

</mosaic_0001>

<bundles_post_ra>
// kernel: tpu_custom_call.1
= control target key start
LH: loop header
LB: loop body
LE: loop exit
PB: predicated region body
PF: predicated region fallthrough
CT: control target
= control target key end

     0   :  { %s3813_s0 = inlined_call_operand.hbm [shape: bf16[2,16,16,128], index: 0, kind: input, shape index: {}]   ;;  %s3814_s1 = inlined_call_operand.hbm [shape: bf16[2,16,16,128], index: 1, kind: input, shape index: {}]   ;;  %s3815_s2 = inlined_call_operand.hbm [shape: bf16[2,16,16,128], index: 2, kind: input, shape index: {}]   ;;  %s3816_s3 = inlined_call_operand.hbm [shape: bf16[128,128], index: 3, kind: input, shape index: {}]   ;;  %s3817_s4 = inlined_call_operand.vmem [shape: f32[1,128], index: 4, kind: input, shape index: {}]   ;;  %s3818_s5 = inlined_call_operand.vmem [shape: f32[1,128], index: 5, kind: input, shape index: {}]   ;;  %s3819_s6 = inlined_call_operand.vmem [shape: f32[3,3,128], index: 6, kind: input, shape index: {}]   ;;  %s3820_s7 = inlined_call_operand.vmem [shape: f32[1,128], index: 7, kind: input, shape index: {}]   ;;  %s3821_s8 = inlined_call_operand.vmem [shape: f32[1,128], index: 8, kind: input, shape index: {}]   ;;  %s3822_s9 = inlined_call_operand.hbm [shape: bf16[2,16,16,128], index: 9, kind: output, shape index: {0}]   ;;  %s3823_s10 = inlined_call_operand.hbm [shape: f32[2,1,128], index: 10, kind: output, shape index: {1}]  }
   0x1   :  { %3930 = sst [smem:[#allocation80_spill]] %s3813_s0 }
   0x2   :  { %3931 = sst [smem:[#allocation81_spill]] %s3814_s1 }
   0x3   :  { %3932 = sst [smem:[#allocation82_spill]] %s3815_s2 }
   0x4   :  { %3933 = sst [smem:[#allocation83_spill]] %s3816_s3 }
   0x5   :  { %3934 = sst [smem:[#allocation84_spill]] %s3817_s4 }
   0x6   :  { %3935 = sst [smem:[#allocation85_spill]] %s3818_s5 }
   0x7   :  { %3936 = sst [smem:[#allocation86_spill]] %s3819_s6 }
   0x8   :  { %3937 = sst [smem:[#allocation87_spill]] %s3820_s7 }
   0x9   :  { %3938 = sst [smem:[#allocation88_spill]] %s3821_s8 }
   0xa   :  { %3939 = sst [smem:[#allocation89_spill]] %s3822_s9 }
   0xb   :  { %3940 = sst [smem:[#allocation90_spill]] %s3823_s10 }
   0xc   :  { %16 = vsyncpa [#allocation4], 0 }
   0xd   :  { %18 = vsyncpa [#allocation4 + $0x1], 0 }
   0xe   :  { %19 = vsyncpa [#allocation7], 0 }
   0xf   :  { %21 = vsyncpa [#allocation7 + $0x1], 0 }
  0x10   :  { %22 = vsyncpa [#allocation10], 0 }
  0x11   :  { %23 = vsyncpa [#allocation5], 0 }
  0x12   :  { %25 = vsyncpa [#allocation5 + $0x1], 0 }
  0x13   :  { %26 = vsyncpa [#allocation13], 0 }
  0x14   :  { %28 = vsyncpa [#allocation13 + $0x1], 0  ;;  %s2732_s13 = smov 0   ;;  %s2734_s14 = smov 0  }
  0x15   :  { %s2736_s15 = smov 0   ;;  %s2738_s16 = smov 0  }
  0x16   :  { %s2740_s17 = smov 0   ;;  %s2742_s18 = smov 0  }
  0x17   :  { %s2744_s19 = smov 0   ;;  %s2746_s20 = smov 0  }
  0x18   :  { %s2748_s21 = smov 0   ;;  %s2750_s22 = smov 0  }
  0x19   :  { %s2752_s23 = smov 0   ;;  %s2754_s24 = smov 0  }
  0x1a   :  { %s2756_s25 = smov 0   ;;  %s2758_s26 = smov 0  }
  0x1b   :  { %s2760_s27 = smov 0   ;;  %s2762_s28 = smov 0  }
  0x1c   :  { %s2764_s29 = smov 0  }
  0x1d LB: > { %3941 = sst [smem:[#allocation20_spill]] %s2597_s13  ;;  %s1911_s30 = sadd.s32 4294967294, %s2661_s29   ;;  %s2661_s29 = sphi %s2764_s29, %s34_s29   ;;  %s2657_s28 = sphi %s2762_s28, %s4148_s28   ;;  %s2653_s27 = sphi %s2760_s27, %s4147_s27   ;;  %s2649_s26 = sphi %s2758_s26, %s4146_s26   ;;  %s2645_s25 = sphi %s2756_s25, %s4145_s25   ;;  %s2641_s24 = sphi %s2754_s24, %s4155_s24   ;;  %s2637_s23 = sphi %s2752_s23, %s4154_s23   ;;  %s2633_s22 = sphi %s2750_s22, %s4153_s22   ;;  %s2629_s21 = sphi %s2748_s21, %s4144_s21   ;;  %s2625_s20 = sphi %s2746_s20, %s4152_s20   ;;  %s2621_s19 = sphi %s2744_s19, %s4151_s19   ;;  %s2617_s18 = sphi %s2742_s18, %s4150_s18   ;;  %s2613_s17 = sphi %s2740_s17, %s4142_s17   ;;  %s2609_s16 = sphi %s2738_s16, %s4141_s16   ;;  %s2605_s15 = sphi %s2736_s15, %s4140_s15   ;;  %s2601_s14 = sphi %s2734_s14, %s4139_s14   ;;  %s2597_s13 = sphi %s2732_s13, %s4138_s13  }
  0x1e   : > { %3942 = sst [smem:[#allocation21_spill]] %s2601_s14  ;;  %s43_s11 = sadd.s32 1, %s2653_s27 }
  0x1f   : > { %3943 = sst [smem:[#allocation22_spill]] %s2605_s15  ;;  %p44_p0 = scmp.ge.s32.totalorder %s43_s11, 2 }
  0x20   : > { %3944 = sst [smem:[#allocation23_spill]] %s2609_s16  ;;  %s46_s12 = sadd.s32 1, %s2657_s28 }
  0x21   : > { %3945 = sst [smem:[#allocation24_spill]] %s2613_s17  ;;  %p3836_p1 = scmp.eq.s32.totalorder %s2661_s29, 0 }
  0x22   : > { %3946 = sst [smem:[#allocation25_spill]] %s2617_s18  ;;  %s91_s10 = sadd.s32 1, %s2629_s21 }
  0x23   : > { %3947 = sst [smem:[#allocation26_spill]] %s2621_s19  ;;  %s4157_s11 = smov (%p44_p0, %s43_s11), 0 }
  0x24   : > { %3948 = sst [smem:[#allocation27_spill]] %s2629_s21  ;;  %s4159_s12 = smov (!%p44_p0, %s46_s12), %s2657_s28 }
  0x25   : > { %3949 = sst [smem:[#allocation28_spill]] %s2633_s22  ;;  %s87_s9 = ssub.s32 %s2653_s27, %s4157_s11 }
  0x26   : > { %3950 = sst [smem:[#allocation29_spill]] %s2645_s25  ;;  %p3837_p2 = scmp.ne.s32.totalorder %s2629_s21, %s2625_s20 }
  0x27   : > { %3951 = sst [smem:[#allocation30_spill]] %s2649_s26  ;;  %p48_p3 = scmp.ge.s32.totalorder %s4159_s12, 2 }
  0x28   : > { %3952 = sst [smem:[#allocation31_spill]] %s2653_s27  ;;  %p3838_p4 = scmp.ne.s32.totalorder %s2625_s20, %s2621_s19 }
  0x29   : > { %3953 = sst [smem:[#allocation32_spill]] %s2657_s28  ;;  %p2836_p5 = por %p3837_p2, %p3836_p1 }
  0x2a   : > { %3954 = sst [smem:[#allocation33_spill]] %s4157_s11  ;;  %p2840_p6 = scmp.eq.s32.totalorder %s1911_s30, 3 }
  0x2b   : > { %s4161_s12 = smov (%p48_p3, %s4159_s12), 0  ;;  %p3835_p10 = scmp.lt.s32.totalorder %s2661_s29, 4 }
  0x2c   : > { %3957 = sst [smem:[#allocation34_spill]] %s4161_s12  ;;  %p2851_p7 = por %p2840_p6, %p3838_p4 }
  0x2d   : > { %s2857_s6 = ssub.s32 %s2657_s28, %s4161_s12  ;;  %s2863_s30 = sshll.u32 %s2657_s28, 5 }
  0x2e   : > { %s3958_s7 = scalar_select %p2851_p7, 1, 0 }
  0x2f   : > { %s88_s25 = sor.u32 %s87_s9, %s2857_s6  ;;  %s399_s4 = sand.u32 1, %s2661_s29  }
  0x30   : > { %3959 = sst [smem:[#allocation35_spill]] %s3958_s7  ;;  %p89_p9 = scmp.eq.s32.totalorder %s88_s25, 0 }
  0x31   : > { %s401_s2 = sand.u32 1, %s2629_s21   ;;  %s1992_s17 = sshll.u32 %s2653_s27, 4 }
  0x32   : > { %s2866_s5 = scalar_select %p89_p9, %s2629_s21, %s91_s10  }
  0x33   : > { %s1927_s16 = sshll.u32 %s401_s2, 6  ;;  %s410_s7 = sadd.s32 %s1992_s17, %s2863_s30 }
  0x34   : > { %3960 = sst [smem:[#allocation36_spill]] %s2866_s5  ;;  %s403_s12 = scalar_lea.vmem [#allocation6], %s1927_s16 }
  0x35   : > { %s413_s18 = sshll.u32 %s403_s12, 4  ;;  %s1931_s0 = sshll.u32 %s410_s7, 6  ;;  %s2872_s18 = int_to_ptr.vmem [resolvable:$true] %s413_s18 }
  0x36   : > { %s3961_s1 = sld [smem:[#allocation81_spill]]  ;;  %p2883_p11 = pnand %p3835_p10, %p2836_p5 }
  0x37   : > { %s2887_s7 = scalar_lea.sflag [#allocation7], %s399_s4 }
  0x38   : > { %p2331_p13 = pneg %p2883_p11 }
  0x3c   : > { %s2877_s25 = scalar_lea.hbm %s3961_s1, %s1931_s0  ;;  %s2334_s17 = scalar_lea.hbm %s3961_s1, 4096 }
  0x3d   : > { %s2329_s10 = scalar_lea.hbm %s2877_s25, 1024  ;;  %p2335_p5 = scmp.lt.u32.totalorder %s2877_s25, %s3961_s1 }
  0x3e   : > { %p2330_p12 = scmp.ne.s32.totalorder %s2877_s25, %s2329_s10  ;;  %p2336_p9 = scmp.lt.u32.totalorder %s2334_s17, %s2329_s10 }
  0x3f   : > { %p2338_p1 = scmp.lt.u32.totalorder %s2329_s10, %s2877_s25 }
  0x40   : > { %p2332_p0 = pnand %p2331_p13, %p2330_p12  ;;  %p2337_p10 = por %p2336_p9, %p2335_p5 }
  0x42   : > { %p2333_p3 = pneg %p2332_p0  ;;  %p2339_p8 = por %p2338_p1, %p2337_p10 }
  0x44   : > { %p2340_p2 = pnand %p2339_p8, %p2333_p3 }
  0x46   : > { %2343 = shalt.err (!%p2340_p2)
}
  0x47   : > { %s2344_s4 = scalar_lea.vmem %s2872_s18, 1024  ;;  %s2663_s12 = smov [#allocation6]  }
  0x48   : > { %p2345_p12 = scmp.ne.s32.totalorder %s2872_s18, %s2344_s4  ;;  %s2349_s9 = sshll.u32 %s2663_s12, 4  ;;  %s2350_s9 = int_to_ptr.vmem [resolvable:$false] %s2349_s9 }
  0x49   : > { %s2351_s0 = scalar_lea.vmem %s2350_s9, 2048  ;;  %p2352_p7 = scmp.lt.s32.totalorder %s2872_s18, %s2350_s9 }
  0x4a   : > { %p2347_p0 = pnand %p2345_p12, %p2331_p13  ;;  %p2353_p5 = scmp.lt.s32.totalorder %s2351_s0, %s2344_s4 }
  0x4c   : > { %p2348_p4 = pneg %p2347_p0  ;;  %p2354_p9 = por %p2353_p5, %p2352_p7 }
  0x4e   : > { %p2355_p1 = pnand %p2354_p9, %p2348_p4 }
  0x50   : > { %2358 = shalt.err (!%p2355_p1)
}
  0x51   : > { %s3839_s10 = smov 64   ;;  %s3841_s16 = smov 4  }
  0x52   : > { %2151 = dma.hbm_to_vmem [thread:$0]  (!%p2883_p11), %s2877_s25, 1024, %s2872_s18, %s2887_s7, %s3839_s10, %s3839_s10, %s3841_s16  }
  0x53   : > { %s2919_s17 = sadd.s32 4294967295, %s2661_s29   ;;  %s307_s22 = sadd.s32 1, %s2605_s15 }
  0x54   : > { %p3845_p2 = scmp.eq.s32.totalorder %s2919_s17, 0  ;;  %p292_p4 = scmp.eq.s32.totalorder %s2919_s17, 3 }
  0x55   : > { %p317_p7 = scmp.ne.s32.totalorder %s2605_s15, %s2601_s14  ;;  %p3963_p8 = scmp.ne.s32.totalorder %s2625_s20, %s2621_s19 }
  0x56   : > { %p3965_p13 = scmp.ne.s32.totalorder %s2629_s21, %s2625_s20  ;;  %p3968_p11 = scmp.eq.s32.totalorder %s2857_s6, 0 }
  0x57   : > { %p2931_p10 = por %p3963_p8, %p3845_p2  ;;  %p2947_p12 = por %p317_p7, %p292_p4 }
  0x58   : > { %p2938_p3 = por %p292_p4, %p3965_p13  ;;  %p323_p0 = scmp.ne.s32.totalorder %s2601_s14, %s2597_s13 }
  0x59   : > { %s3964_s26 = scalar_select %p2931_p10, 1, 0 }
  0x5a   : > { %s3966_s18 = scalar_select %p2938_p3, 1, 0 }
  0x5b   : > { %s2945_s25 = scalar_select %p3968_p11, %s2605_s15, %s307_s22  }
  0x5c   : > { %3967 = sst [smem:[#allocation37_spill]] %s3966_s18  ;;  %p1918_p5 = scmp.ge.s32.totalorder %s2661_s29, 1 }
  0x5d   : > { %3969 = sst [smem:[#allocation38_spill]] %s2945_s25  ;;  %p331_p9 = scmp.lt.s32.totalorder %s2661_s29, 5 }
  0x5e   : > { %s3970_s2 = scalar_select %p2947_p12, 1, 0 }
  0x5f   : > { %p2957_p1 = por %p323_p0, %p2840_p6  ;;  %p2961_p8 = pnand %p1918_p5, %p331_p9 }
  0x60   : > { %3971 = sst [smem:[#allocation39_spill]] %s3970_s2  ;;  %s2666_s9 = smov [#allocation9]  }
  0x61   : > { %s3972_s4 = scalar_select %p2957_p1, 1, 0 }
  0x62   : > { %s3974_s12 = scalar_select %p2961_p8, 1, 0 }
  0x63   : > { %3973 = sst [smem:[#allocation40_spill]] %s3972_s4  ;;  %s343_s0 = sshll.u32 %s2666_s9, 4  ;;  %s344_s0 = int_to_ptr.vmem [resolvable:$true] %s343_s0 }
  0x64   : > { %3975 = sst [smem:[#allocation41_spill]] %s3974_s12  ;;  %p2141_p4 = pneg %p2961_p8 }
  0x65   : > { %s1912_s8 = sshll.u32 %s2653_s27, 3  ;;  %s3977_s3 = sld [smem:[#allocation83_spill]] }
  0x66   : > { %p2969_p7 = pnand %p2141_p4, %p3845_p2 }
  0x68   : > { %p2361_p13 = pneg %p2969_p7 }
  0x6b   : > { %s2359_s1 = scalar_lea.hbm %s3977_s3, 1024 }
  0x6c   : > { %p2360_p6 = scmp.ne.s32.totalorder %s3977_s3, %s2359_s1  ;;  %p2366_p5 = scmp.lt.u32.totalorder %s2359_s1, %s3977_s3 }
  0x6e   : > { %p2362_p11 = pnand %p2361_p13, %p2360_p6 }
  0x70   : > { %p2363_p0 = pneg %p2362_p11 }
  0x72   : > { %p2368_p9 = pnand %p2366_p5, %p2363_p0 }
  0x74   : > { %2371 = shalt.err (!%p2368_p9)
}
  0x75   : > { %s2372_s25 = scalar_lea.vmem %s344_s0, 1024  ;;  %p2380_p12 = scmp.lt.s32.totalorder %s344_s0, %s344_s0 }
  0x76   : > { %p2373_p4 = scmp.ne.s32.totalorder %s344_s0, %s2372_s25  ;;  %p2381_p3 = scmp.lt.s32.totalorder %s2372_s25, %s2372_s25 }
  0x78   : > { %p2375_p2 = pnand %p2373_p4, %p2361_p13  ;;  %p2382_p10 = por %p2381_p3, %p2380_p12 }
  0x7a   : > { %p2376_p1 = pneg %p2375_p2 }
  0x7c   : > { %p2383_p8 = pnand %p2382_p10, %p2376_p1 }
  0x7e   : > { %2386 = shalt.err (!%p2383_p8)
}
  0x7f   : > { %s3978_s5 = smov 4   ;;  %s3979_s28 = smov 64  }
  0x80   : > { %s3980_s1 = sld [smem:[#allocation28_spill]]  ;;  %s1913_s21 = sadd.s32 4294967295, %s1912_s8 }
  0x81   : > { %2144 = dma.hbm_to_vmem [thread:$0]  (!%p2969_p7), %s3977_s3, 1024, %s344_s0, [#allocation10], %s3979_s28, %s3979_s28, %s3978_s5  }
  0x82   : > { %s1914_s25 = sshll.u32 %s4157_s11, 3  ;;  %p52_p2 = scmp.gt.s32.totalorder %s1913_s21, 0 }
  0x83   : > { %s1915_s22 = sadd.s32 4294967295, %s1914_s25  ;;  %s63_s9 = sadd.s32 1, %s2641_s24 }
  0x84   : > { %p56_p10 = scmp.gt.s32.totalorder %s1915_s22, 0  ;;  %s4163_s21 = smov (!%p52_p2, %s1913_s21), 0 }
  0x85   : > { %p70_p3 = scmp.ne.s32.totalorder %s2641_s24, %s2637_s23  ;;  %s3003_s16 = sadd.s32 8, %s1912_s8 }
  0x86   : > { %s4165_s22 = smov (!%p56_p10, %s1915_s22), 0  ;;  %p76_p12 = scmp.ne.s32.totalorder %s2637_s23, %s3980_s1 }
  0x87   : > { %s59_s10 = ssub.s32 %s4163_s21, %s4165_s22  ;;  %p3981_p1 = scmp.eq.s32.totalorder %s2661_s29, 0 }
  0x88   : > { %s60_s0 = sor.u32 %s59_s10, %s2857_s6  ;;  %p3983_p6 = scmp.eq.s32.totalorder %s2919_s17, 0 }
  0x89   : > { %p3008_p8 = por %p3981_p1, %p70_p3  ;;  %p61_p7 = scmp.eq.s32.totalorder %s60_s0, 0 }
  0x8a   : > { %p3014_p13 = por %p3983_p6, %p76_p12  ;;  %s3019_s1 = sadd.s32 8, %s1914_s25 }
  0x8b   : > { %s3022_s8 = scalar_select %p61_p7, %s2641_s24, %s63_s9  }
  0x8c   : > { %s372_s22 = sand.u32 1, %s2641_s24   ;;  %s1924_s27 = sshll.u32 %s4163_s21, 1 }
  0x8d   : > { %s1921_s10 = sshll.u32 %s372_s22, 3  ;;  %s386_s15 = sadd.s32 %s2863_s30, %s1924_s27 }
  0x8e   : > { %s376_s4 = scalar_lea.vmem [#allocation3], %s1921_s10  ;;  %s1926_s19 = sshll.u32 %s386_s15, 6 }
  0x8f   : > { %s389_s13 = sshll.u32 %s376_s4, 4  ;;  %s3985_s18 = sld [smem:[#allocation80_spill]]  ;;  %s3027_s13 = int_to_ptr.vmem [resolvable:$true] %s389_s13 }
  0x90   : > { %p3987_p5 = scmp.lt.s32.totalorder %s2661_s29, 4  ;;  %s3042_s15 = scalar_lea.sflag [#allocation4], %s372_s22 }
  0x92   : > { %p3038_p9 = pnand %p3987_p5, %p3008_p8 }
  0x94   : > { %p2389_p2 = pneg %p3038_p9 }
  0x95   : > { %s3986_s12 = smov %s3985_s18  ;;  %s3032_s14 = scalar_lea.hbm %s3985_s18, %s1926_s19 }
  0x96   : > { %s2387_s27 = scalar_lea.hbm %s3032_s14, 128  ;;  %s2392_s18 = scalar_lea.hbm %s3986_s12, 4096 }
  0x97   : > { %p2388_p4 = scmp.ne.s32.totalorder %s3032_s14, %s2387_s27  ;;  %p2393_p12 = scmp.lt.u32.totalorder %s3032_s14, %s3986_s12 }
  0x98   : > { %p2394_p1 = scmp.lt.u32.totalorder %s2392_s18, %s2387_s27  ;;  %p2396_p7 = scmp.lt.u32.totalorder %s2387_s27, %s3032_s14 }
  0x99   : > { %p2390_p10 = pnand %p2389_p2, %p2388_p4 }
  0x9a   : > { %p2395_p8 = por %p2394_p1, %p2393_p12 }
  0x9b   : > { %p2391_p3 = pneg %p2390_p10 }
  0x9c   : > { %p2397_p6 = por %p2396_p7, %p2395_p8 }
  0x9e   : > { %p2398_p5 = pnand %p2397_p6, %p2391_p3 }
  0xa0   : > { %2401 = shalt.err (!%p2398_p5)
}
  0xa1   : > { %s2402_s21 = scalar_lea.vmem %s3027_s13, 128  ;;  %s2667_s9 = smov [#allocation3]  }
  0xa2   : > { %p2403_p4 = scmp.ne.s32.totalorder %s3027_s13, %s2402_s21  ;;  %s2407_s22 = sshll.u32 %s2667_s9, 4  ;;  %s2408_s22 = int_to_ptr.vmem [resolvable:$false] %s2407_s22 }
  0xa3   : > { %s2409_s10 = scalar_lea.vmem %s2408_s22, 256  ;;  %p2410_p11 = scmp.lt.s32.totalorder %s3027_s13, %s2408_s22 }
  0xa4   : > { %p2405_p10 = pnand %p2403_p4, %p2389_p2  ;;  %p2411_p12 = scmp.lt.s32.totalorder %s2409_s10, %s2402_s21 }
  0xa6   : > { %p2406_p0 = pneg %p2405_p10  ;;  %p2412_p1 = por %p2411_p12, %p2410_p11 }
  0xa8   : > { %p2413_p8 = pnand %p2412_p1, %p2406_p0 }
  0xaa   : > { %2416 = shalt.err (!%p2413_p8)
}
  0xab   : > { %s3989_s0 = sld [smem:[#allocation25_spill]]  ;;  %s3990_s27 = sld [smem:[#allocation24_spill]] }
  0xac   : > { %s3991_s3 = sld [smem:[#allocation23_spill]]  ;;  %p3992_p11 = scmp.lt.s32.totalorder %s3003_s16, 15 }
  0xad   : > { %2148 = dma.hbm_to_vmem [thread:$0]  (!%p3038_p9), %s3032_s14, 128, %s3027_s13, %s3042_s15, %s3979_s28, %s3979_s28, %s3978_s5  }
  0xae   : > { %s4167_s16 = smov (!%p3992_p11, %s3003_s16), 15  ;;  %p3993_p0 = scmp.lt.s32.totalorder %s3019_s1, 15 }
  0xaf   : > { %p3994_p7 = scmp.eq.s32.totalorder %s2661_s29, 0  ;;  %p3995_p4 = scmp.eq.s32.totalorder %s2919_s17, 0 }
  0xb0   : > { %s4169_s1 = smov (!%p3993_p0, %s3019_s1), 15  ;;  %s1934_s14 = sshll.u32 %s4167_s16, 1 }
  0xb1   : > { %s127_s25 = sadd.s32 1, %s3989_s0  ;;  %p134_p2 = scmp.ne.s32.totalorder %s3989_s0, %s3990_s27 }
  0xb2   : > { %p140_p3 = scmp.ne.s32.totalorder %s3990_s27, %s3991_s3  ;;  %s123_s19 = ssub.s32 %s4167_s16, %s4169_s1 }
  0xb3   : > { %s425_s18 = sand.u32 1, %s3989_s0   ;;  %s124_s2 = sor.u32 %s123_s19, %s2857_s6 }
  0xb4   : > { %p136_p6 = por %p134_p2, %p3994_p7  ;;  %p125_p5 = scmp.eq.s32.totalorder %s124_s2, 0 }
  0xb5   : > { %p3090_p10 = por %p140_p3, %p3995_p4  ;;  %s1932_s13 = sshll.u32 %s425_s18, 3 }
  0xb6   : > { %s4171_s0 = smov (!%p125_p5, %s3989_s0), %s127_s25  ;;  %s437_s15 = sadd.s32 %s1934_s14, %s2863_s30 }
  0xb7   : > { %s3996_s4 = scalar_select %p3090_p10, 1, 0 }
  0xb8   : > { %s1936_s21 = sshll.u32 %s437_s15, 6  ;;  %s427_s9 = scalar_lea.vmem [#allocation8], %s1932_s13 }
  0xb9   : > { %s440_s22 = sshll.u32 %s427_s9, 4  ;;  %s3997_s27 = sld [smem:[#allocation82_spill]]  ;;  %s3103_s22 = int_to_ptr.vmem [resolvable:$true] %s440_s22 }
  0xba   : > { %p3999_p9 = scmp.lt.s32.totalorder %s2661_s29, 4 }
  0xbc   : > { %p3107_p12 = pnand %p3999_p9, %p136_p6 }
  0xbe   : > { %p2419_p8 = pneg %p3107_p12 }
  0xbf   : > { %s3998_s3 = smov %s3997_s27  ;;  %s3101_s6 = scalar_lea.hbm %s3997_s27, %s1936_s21 }
  0xc0   : > { %s2417_s30 = scalar_lea.hbm %s3101_s6, 128  ;;  %s2422_s18 = scalar_lea.hbm %s3998_s3, 4096 }
  0xc1   : > { %p2418_p1 = scmp.ne.s32.totalorder %s3101_s6, %s2417_s30  ;;  %p2423_p2 = scmp.lt.u32.totalorder %s3101_s6, %s3998_s3 }
  0xc2   : > { %p2424_p3 = scmp.lt.u32.totalorder %s2422_s18, %s2417_s30  ;;  %p2426_p6 = scmp.lt.u32.totalorder %s2417_s30, %s3101_s6 }
  0xc3   : > { %p2420_p11 = pnand %p2419_p8, %p2418_p1 }
  0xc4   : > { %p2425_p7 = por %p2424_p3, %p2423_p2 }
  0xc5   : > { %p2421_p0 = pneg %p2420_p11 }
  0xc6   : > { %p2427_p5 = por %p2426_p6, %p2425_p7 }
  0xc8   : > { %p2428_p4 = pnand %p2427_p5, %p2421_p0 }
  0xca   : > { %2431 = shalt.err (!%p2428_p4)
}
  0xcb   : > { %s2432_s14 = scalar_lea.vmem %s3103_s22, 128  ;;  %s2668_s15 = smov [#allocation8]  }
  0xcc   : > { %p2433_p9 = scmp.ne.s32.totalorder %s3103_s22, %s2432_s14  ;;  %s2437_s21 = sshll.u32 %s2668_s15, 4  ;;  %s2438_s21 = int_to_ptr.vmem [resolvable:$false] %s2437_s21 }
  0xcd   : > { %s2439_s9 = scalar_lea.vmem %s2438_s21, 256  ;;  %p2440_p10 = scmp.lt.s32.totalorder %s3103_s22, %s2438_s21 }
  0xce   : > { %p2435_p1 = pnand %p2433_p9, %p2419_p8  ;;  %p2441_p2 = scmp.lt.s32.totalorder %s2439_s9, %s2432_s14 }
  0xd0   : > { %p2436_p11 = pneg %p2435_p1  ;;  %p2442_p3 = por %p2441_p2, %p2440_p10 }
  0xd2   : > { %p2443_p7 = pnand %p2442_p3, %p2436_p11 }
  0xd4   : > { %2446 = shalt.err (!%p2443_p7)
}
  0xd5   : > { %2154 = dma.hbm_to_vmem [thread:$0]  (!%p3107_p12), %s3101_s6, 128, %s3103_s22, %s2887_s7, %s3979_s28, %s3979_s28, %s3978_s5  }
  0xd6   : > { %s4001_s10 = sld [smem:[#allocation41_spill]] }
  0xdc   : > { %p4002_p8 = scmp.ne.s32.totalorder %s4001_s10, 0 }
  0xde   : > { %452 = sbr.rel (%p4002_p8) target bundleno = 761 (0x2f9), region = 56 }
  0xe5   : > { %s454_s1 = sand.u32 1, %s2637_s23  }
  0xe6   : > { %s3143_s27 = sshll.u32 %s454_s1, 3  ;;  %s455_s30 = scalar_lea.sflag [#allocation4], %s454_s1 }
  0xe7   : > { %s458_s25 = scalar_lea.vmem [#allocation3], %s3143_s27 }
  0xe8   : > { %2572 = dma.done.wait (%p3014_p13), %s455_s30, 128  }
  0xe9   : > { %2574 = vsyncadd (%p3014_p13), %s455_s30, 4294967168  ;;  %s463_s7 = sand.u32 1, %s2919_s17   ;;  %s465_s5 = sand.u32 1, %s2625_s20  }
  0xea   : > { %s3154_s28 = sshll.u32 %s465_s5, 6  ;;  %s464_s22 = scalar_lea.sflag [#allocation7], %s463_s7 }
  0xeb   : > { %s3157_s6 = scalar_lea.vmem [#allocation6], %s3154_s28  ;;  %p4003_p10 = scmp.ne.s32.totalorder %s3964_s26, 0 }
  0xed   : > { %2576 = dma.done.wait (%p4003_p10), %s464_s22, 1024  }
  0xee   : > { %2578 = vsyncadd (%p4003_p10), %s464_s22, 4294966272  ;;  %s4004_s11 = sld [smem:[#allocation24_spill]]  ;;  %p4005_p13 = scmp.ne.s32.totalorder %s3996_s4, 0 }
  0xf4   : > { %s474_s16 = sand.u32 1, %s4004_s11  }
  0xf5   : > { %s3164_s19 = sshll.u32 %s474_s16, 3 }
  0xf6   : > { %s476_s18 = scalar_lea.vmem [#allocation8], %s3164_s19 }
  0xf7   : > { %2580 = dma.done.wait (%p4005_p13), %s464_s22, 128  }
  0xf8   : > { %2582 = vsyncadd (%p4005_p13), %s464_s22, 4294967168  ;;  %p4006_p12 = scmp.eq.s32.totalorder %s2919_s17, 0 }
  0xfa   : > { %2584 = dma.done.wait (%p4006_p12), [#allocation10], 1024   ;;  %p4007_p0 = pmov %p4006_p12 }
  0xfb   : > { %s4008_s26 = sld [smem:[#allocation21_spill]]  ;;  %v2669_v0 = vmov 0.0   ;;  %v2311_v1 = vld [vmem:[#allocation9] sm:$0xff]   ;;  %v2312_v2 = vld [vmem:[#allocation9 + $0x8] sm:$0xff]   ;;  %v2313_v3 = vld [vmem:[#allocation9 + $0x10] sm:$0xff]   ;;  %s4009_s13 = sld [smem:[#allocation84_spill]] }
  0xfc   : > { %2586 = vsyncadd (%p4007_p0), [#allocation10], 4294966272  ;;  %953 = vst [vmem:[#allocation2] sm:$0x1] %v2669_v0  ;;  %2075 = vmatprep.subr.bf16.mxu0 %v2311_v1  ;;  %2111 = vmatprep.subr.bf16.mxu1 %v2311_v1  ;;  %v2314_v4 = vld [vmem:[#allocation9 + $0x18] sm:$0xff]   ;;  %v2319_v5 = vld [vmem:[%s458_s25] sm:$0xff]  }
  0xfd   : > { %954 = vst [vmem:[#allocation2 + $0x18] sm:$0x1] %v2669_v0  ;;  %955 = vst [vmem:[#allocation2 + $0x30] sm:$0x1] %v2669_v0  ;;  %2076 = vmatpush3.bf16.msra.mxu0 %v2311_v1  ;;  %2119 = vmatpush3.bf16.msra.mxu1 %v2311_v1  ;;  %v2320_v6 = vld [vmem:[%s3157_s6 + $0x28] sm:$0xff]   ;;  %v2315_v7 = vld [vmem:[#allocation9 + $0x20] sm:$0xff]  }
  0xfe   : > { %956 = vst [vmem:[#allocation2 + $0x48] sm:$0x1] %v2669_v0  ;;  %957 = vst [vmem:[#allocation2 + $0x60] sm:$0x1] %v2669_v0  ;;  %2077 = vmatprep.subr.bf16.mxu0 %v2312_v2  ;;  %2112 = vmatprep.subr.bf16.mxu1 %v2312_v2  ;;  %v2316_v8 = vld [vmem:[#allocation9 + $0x28] sm:$0xff]   ;;  %v2317_v9 = vld [vmem:[#allocation9 + $0x30] sm:$0xff]  }
  0xff   : > { %958 = vst [vmem:[#allocation2 + $0x78] sm:$0x1] %v2669_v0  ;;  %959 = vst [vmem:[#allocation2 + $0x90] sm:$0x1] %v2669_v0  ;;  %2091 = vmatprep.mubr.bf16.mxu0 %v2319_v5  ;;  %2103 = vmatprep.mubr.bf16.mxu1 %v2320_v6  ;;  %v2318_v10 = vld [vmem:[#allocation9 + $0x38] sm:$0xff]   ;;  %v2321_v11 = vld [vmem:[%s3157_s6] sm:$0xff]  }
 0x100   : > { %960 = vst [vmem:[#allocation2 + $0xa8] sm:$0x1] %v2669_v0  ;;  %961 = vst [vmem:[#allocation2 + $0xc0] sm:$0x1] %v2669_v0  ;;  %v2322_v12 = vld [vmem:[%s3157_s6 + $0x30] sm:$0xff]   ;;  %v2323_v13 = vld [vmem:[%s3157_s6 + $0x8] sm:$0xff]  }
 0x101   : > { %s529_s2 = sand.u32 1, %s4008_s26   ;;  %962 = vst [vmem:[#allocation2 + $0xd8] sm:$0x1] %v2669_v0  ;;  %963 = vst [vmem:[#allocation2 + $0x11] sm:$0x1] %v2669_v0  ;;  %2078 = vmatpush3.bf16.msra.mxu0 %v2312_v2  ;;  %2120 = vmatpush3.bf16.msra.mxu1 %v2312_v2  ;;  %v2324_v14 = vld [vmem:[%s3157_s6 + $0x38] sm:$0xff]  }
 0x102   : > { %964 = vst [vmem:[#allocation2 + $0x29] sm:$0x1] %v2669_v0  ;;  %965 = vst [vmem:[#allocation2 + $0x41] sm:$0x1] %v2669_v0  ;;  %2079 = vmatprep.subr.bf16.mxu0 %v2313_v3  ;;  %2113 = vmatprep.subr.bf16.mxu1 %v2313_v3  ;;  %v2325_v15 = vld [vmem:[%s3157_s6 + $0x10] sm:$0xff]   ;;  %v2326_v16 = vld [vmem:[%s476_s18] sm:$0xff]  }
 0x103   : > { %966 = vst [vmem:[#allocation2 + $0x59] sm:$0x1] %v2669_v0  ;;  %967 = vst [vmem:[#allocation2 + $0x71] sm:$0x1] %v2669_v0  ;;  %v2327_v17 = vld [vmem:[%s3157_s6 + $0x18] sm:$0xff]   ;;  %v2328_v18 = vld [vmem:[%s3157_s6 + $0x20] sm:$0xff]  }
 0x104   : > { %968 = vst [vmem:[#allocation2 + $0x89] sm:$0x1] %v2669_v0  ;;  %969 = vst [vmem:[#allocation2 + $0xa1] sm:$0x1] %v2669_v0  ;;  %v3191_v19 = vld [vmem:[%s4009_s13] ss:$0 sm:$0xff] }
 0x105   : > { %970 = vst [vmem:[#allocation2 + $0xb9] sm:$0x1] %v2669_v0  ;;  %971 = vst [vmem:[#allocation2 + $0xd1] sm:$0x1] %v2669_v0  ;;  %2080 = vmatpush3.bf16.msra.mxu0 %v2313_v3  ;;  %2121 = vmatpush3.bf16.msra.mxu1 %v2313_v3  ;;  %s4010_s21 = sld [smem:[#allocation85_spill]]  ;;  %s3239_s9 = scalar_lea.vmem [#allocation11], %s3154_s28 }
 0x106   : > { %972 = vst [vmem:[#allocation2 + $0xe9] sm:$0x1] %v2669_v0  ;;  %2081 = vmatprep.subr.bf16.mxu0 %v2314_v4  ;;  %2114 = vmatprep.subr.bf16.mxu1 %v2314_v4  ;;  %s3243_s10 = scalar_lea.vmem [#allocation12], %s529_s2  ;;  %s4011_s1 = sld [smem:[#allocation29_spill]] }
 0x109   : > { %2082 = vmatpush3.bf16.msra.mxu0 %v2314_v4  ;;  %2122 = vmatpush3.bf16.msra.mxu1 %v2314_v4 }
 0x10a   : > { %2083 = vmatprep.subr.bf16.mxu0 %v2315_v7  ;;  %2115 = vmatprep.subr.bf16.mxu1 %v2315_v7 }
 0x10b   : > { %v3196_v21 = vld [vmem:[%s4010_s21] ss:$0 sm:$0xff] }
 0x10c   : > { %p1963_p6 = scmp.ne.s32.totalorder %s4011_s1, 0 }
 0x10d   : > { %2084 = vmatpush3.bf16.msra.mxu0 %v2315_v7  ;;  %2123 = vmatpush3.bf16.msra.mxu1 %v2315_v7 }
 0x10e   : > { %2085 = vmatprep.subr.bf16.mxu0 %v2316_v8  ;;  %2116 = vmatprep.subr.bf16.mxu1 %v2316_v8 }
 0x111   : > { %2086 = vmatpush3.bf16.msra.mxu0 %v2316_v8  ;;  %2124 = vmatpush3.bf16.msra.mxu1 %v2316_v8 }
 0x112   : > { %2087 = vmatprep.subr.bf16.mxu0 %v2317_v9  ;;  %2117 = vmatprep.subr.bf16.mxu1 %v2317_v9 }
 0x115   : > { %2088 = vmatpush3.bf16.msra.mxu0 %v2317_v9  ;;  %2125 = vmatpush3.bf16.msra.mxu1 %v2317_v9 }
 0x116   : > { %2089 = vmatprep.subr.bf16.mxu0 %v2318_v10  ;;  %2118 = vmatprep.subr.bf16.mxu1 %v2318_v10 }
 0x119   : > { %2090 = vmatpush3.bf16.msra.mxu0 %v2318_v10  ;;  %2126 = vmatpush3.bf16.msra.mxu1 %v2318_v10 }
 0x11c   : > { %2092 = vmatmul.mubr.bf16.vlgmr.msra.gmra.mrb[0].mxu0 %v2321_v11  ;;  %2104 = vmatmul.mubr.bf16.vlgmr.msra.gmra.mrb[0].mxu1 %v2322_v12 }
 0x11d   : > { %2095 = vmatprep.mubr.bf16.mxu0 %v2323_v13  ;;  %2107 = vmatprep.mubr.bf16.mxu1 %v2324_v14 }
 0x124   : > { %2096 = vmatmul.mubr.bf16.gmra.mrb[4].mxu0 %v2325_v15  ;;  %2108 = vmatmul.mubr.bf16.gmra.mrb[4].mxu1 %v2326_v16 }
 0x125   : > { %2099 = vmatprep.mubr.bf16.mxu0 %v2327_v17 }
 0x12c   : > { %2100 = vmatmul.mubr.bf16.gmra.mrb[8].mxu0 %v2328_v18 }
 0x1ef   : > { %v2093_v20 = vpop.f32.mrb[0].mxu0  ;;  %v2105_v22 = vpop.f32.mrb[0].mxu1 }
 0x1f0   : > { %v808_v23 = vmul.f32 %v2093_v20, %v3191_v19  ;;  %v820_v24 = vmul.f32 %v2105_v22, %v3191_v19  ;;  %v720_v25 = vpop.f32.mrb[1].mxu0  ;;  %v768_v26 = vpop.f32.mrb[1].mxu1 }
 0x1f1   : > { %v806_v27 = vmul.f32 %v3191_v19, %v720_v25  ;;  %v818_v28 = vmul.f32 %v3191_v19, %v768_v26  ;;  %v2094_v29 = vpop.f32.mrb[2].mxu0  ;;  %v2106_v30 = vpop.f32.mrb[2].mxu1 }
 0x1f2   : > { %v835_v31 = vadd.f32 %v3196_v21, %v808_v23  ;;  %v847_v32 = vadd.f32 %v3196_v21, %v820_v24  ;;  %v809_v33 = vmul.f32 %v2094_v29, %v3191_v19  ;;  %v821_v34 = vmul.f32 %v2106_v30, %v3191_v19  ;;  %v723_v35 = vpop.f32.mrb[3].mxu0  ;;  %v771_v36 = vpop.f32.mrb[3].mxu1 }
 0x1f3   : > { %v833_v37 = vadd.f32 %v3196_v21, %v806_v27  ;;  %v845_v38 = vadd.f32 %v3196_v21, %v818_v28  ;;  %v807_v39 = vmul.f32 %v3191_v19, %v723_v35  ;;  %v819_v40 = vmul.f32 %v3191_v19, %v771_v36 }
 0x1f4   : > { %v855_v41 = vadd.f32 3.0, %v835_v31  ;;  %v867_v42 = vadd.f32 3.0, %v847_v32  ;;  %v836_v43 = vadd.f32 %v3196_v21, %v809_v33  ;;  %v848_v44 = vadd.f32 %v3196_v21, %v821_v34 }
 0x1f5   : > { %v853_v45 = vadd.f32 3.0, %v833_v37  ;;  %v865_v46 = vadd.f32 3.0, %v845_v38  ;;  %v834_v47 = vadd.f32 %v3196_v21, %v807_v39  ;;  %v846_v48 = vadd.f32 %v3196_v21, %v819_v40 }
 0x1f6   : > { %v875_v49 = vmax.f32 %v855_v41, 0.0  ;;  %v887_v50 = vmax.f32 %v867_v42, 0.0  ;;  %v856_v51 = vadd.f32 3.0, %v836_v43  ;;  %v868_v52 = vadd.f32 3.0, %v848_v44 }
 0x1f7   : > { %v873_v53 = vmax.f32 %v853_v45, 0.0  ;;  %v885_v54 = vmax.f32 %v865_v46, 0.0  ;;  %v854_v55 = vadd.f32 3.0, %v834_v47  ;;  %v866_v56 = vadd.f32 3.0, %v846_v48  ;;  %v2097_v57 = vpop.f32.mrb[4].mxu0  ;;  %v2109_v58 = vpop.f32.mrb[4].mxu1 }
 0x1f8   : > { %v895_v59 = vmin.f32 %v875_v49, 6.0  ;;  %v907_v60 = vmin.f32 %v887_v50, 6.0  ;;  %v876_v61 = vmax.f32 %v856_v51, 0.0  ;;  %v888_v62 = vmax.f32 %v868_v52, 0.0  ;;  %v736_v63 = vpop.f32.mrb[5].mxu0  ;;  %v784_v0 = vpop.f32.mrb[5].mxu1 }
 0x1f9   : > { %v893_v1 = vmin.f32 %v873_v53, 6.0  ;;  %v905_v2 = vmin.f32 %v885_v54, 6.0  ;;  %v874_v3 = vmax.f32 %v854_v55, 0.0  ;;  %v886_v4 = vmax.f32 %v866_v56, 0.0  ;;  %v2098_v5 = vpop.f32.mrb[6].mxu0  ;;  %v2110_v6 = vpop.f32.mrb[6].mxu1 }
 0x1fa   : > { %v915_v7 = vmul.f32 %v895_v59, %v835_v31  ;;  %v927_v8 = vmul.f32 %v907_v60, %v847_v32  ;;  %v896_v9 = vmin.f32 %v876_v61, 6.0  ;;  %v908_v10 = vmin.f32 %v888_v62, 6.0  ;;  %v739_v11 = vpop.f32.mrb[7].mxu0  ;;  %v787_v12 = vpop.f32.mrb[7].mxu1 }
 0x1fb   : > { %v913_v13 = vmul.f32 %v893_v1, %v833_v37  ;;  %v925_v14 = vmul.f32 %v905_v2, %v845_v38  ;;  %v894_v15 = vmin.f32 %v874_v3, 6.0  ;;  %v906_v16 = vmin.f32 %v886_v4, 6.0 }
 0x1fc   : > { %v935_v17 = vmul.f32 0.16666667, %v915_v7  ;;  %v947_v18 = vmul.f32 0.16666667, %v927_v8  ;;  %v916_v20 = vmul.f32 %v896_v9, %v836_v43  ;;  %v928_v22 = vmul.f32 %v908_v10, %v848_v44 }
 0x1fd   : > { %v933_v23 = vmul.f32 0.16666667, %v913_v13  ;;  %v945_v24 = vmul.f32 0.16666667, %v925_v14  ;;  %v914_v25 = vmul.f32 %v894_v15, %v834_v47  ;;  %v926_v26 = vmul.f32 %v906_v16, %v846_v48 }
 0x1fe   : > { %975 = vst [vmem:[#allocation2 + $0x19] sm:$0xff] %v935_v17  ;;  %987 = vst [vmem:[#allocation2 + $0xa9] sm:$0xff] %v947_v18  ;;  %v936_v27 = vmul.f32 0.16666667, %v916_v20  ;;  %v948_v28 = vmul.f32 0.16666667, %v928_v22  ;;  %v812_v29 = vmul.f32 %v2097_v57, %v3191_v19  ;;  %v824_v30 = vmul.f32 %v2109_v58, %v3191_v19 }
 0x1ff   : > { %973 = vst [vmem:[#allocation2 + $0x1] sm:$0xff] %v933_v23  ;;  %985 = vst [vmem:[#allocation2 + $0x91] sm:$0xff] %v945_v24  ;;  %v934_v31 = vmul.f32 0.16666667, %v914_v25  ;;  %v946_v32 = vmul.f32 0.16666667, %v926_v26  ;;  %v810_v33 = vmul.f32 %v3191_v19, %v736_v63  ;;  %v822_v34 = vmul.f32 %v3191_v19, %v784_v0 }
 0x200   : > { %v2101_v35 = vpop.f32.mrb[8].mxu0  ;;  %976 = vst [vmem:[#allocation2 + $0x21] sm:$0xff] %v936_v27  ;;  %988 = vst [vmem:[#allocation2 + $0xb1] sm:$0xff] %v948_v28  ;;  %v839_v36 = vadd.f32 %v3196_v21, %v812_v29  ;;  %v851_v37 = vadd.f32 %v3196_v21, %v824_v30  ;;  %v813_v38 = vmul.f32 %v2098_v5, %v3191_v19 }
 0x201   : > { %v825_v39 = vmul.f32 %v2110_v6, %v3191_v19  ;;  %v752_v40 = vpop.f32.mrb[9].mxu0  ;;  %974 = vst [vmem:[#allocation2 + $0x9] sm:$0xff] %v934_v31  ;;  %986 = vst [vmem:[#allocation2 + $0x99] sm:$0xff] %v946_v32  ;;  %v837_v41 = vadd.f32 %v3196_v21, %v810_v33  ;;  %v849_v42 = vadd.f32 %v3196_v21, %v822_v34 }
 0x202   : > { %v811_v43 = vmul.f32 %v3191_v19, %v739_v11  ;;  %v823_v44 = vmul.f32 %v3191_v19, %v787_v12  ;;  %v2102_v45 = vpop.f32.mrb[10].mxu0  ;;  %v859_v46 = vadd.f32 3.0, %v839_v36  ;;  %v871_v47 = vadd.f32 3.0, %v851_v37 }
 0x203   : > { %v840_v48 = vadd.f32 %v3196_v21, %v813_v38  ;;  %v852_v49 = vadd.f32 %v3196_v21, %v825_v39  ;;  %v755_v50 = vpop.f32.mrb[11].mxu0  ;;  %v857_v51 = vadd.f32 3.0, %v837_v41  ;;  %v869_v52 = vadd.f32 3.0, %v849_v42 }
 0x204   : > { %v838_v53 = vadd.f32 %v3196_v21, %v811_v43  ;;  %v850_v54 = vadd.f32 %v3196_v21, %v823_v44  ;;  %v879_v55 = vmax.f32 %v859_v46, 0.0  ;;  %v891_v56 = vmax.f32 %v871_v47, 0.0 }
 0x205   : > { %v860_v57 = vadd.f32 3.0, %v840_v48  ;;  %v872_v58 = vadd.f32 3.0, %v852_v49  ;;  %v877_v59 = vmax.f32 %v857_v51, 0.0  ;;  %v889_v60 = vmax.f32 %v869_v52, 0.0 }
 0x206   : > { %v858_v61 = vadd.f32 3.0, %v838_v53  ;;  %v870_v62 = vadd.f32 3.0, %v850_v54  ;;  %v899_v63 = vmin.f32 %v879_v55, 6.0  ;;  %v911_v0 = vmin.f32 %v891_v56, 6.0 }
 0x207   : > { %v880_v1 = vmax.f32 %v860_v57, 0.0  ;;  %v892_v2 = vmax.f32 %v872_v58, 0.0  ;;  %v897_v3 = vmin.f32 %v877_v59, 6.0  ;;  %v909_v4 = vmin.f32 %v889_v60, 6.0 }
 0x208   : > { %v878_v5 = vmax.f32 %v858_v61, 0.0  ;;  %v890_v6 = vmax.f32 %v870_v62, 0.0  ;;  %v919_v7 = vmul.f32 %v899_v63, %v839_v36  ;;  %v931_v8 = vmul.f32 %v911_v0, %v851_v37 }
 0x209   : > { %v900_v9 = vmin.f32 %v880_v1, 6.0  ;;  %v912_v10 = vmin.f32 %v892_v2, 6.0  ;;  %v917_v11 = vmul.f32 %v897_v3, %v837_v41  ;;  %v929_v12 = vmul.f32 %v909_v4, %v849_v42 }
 0x20a   : > { %v898_v13 = vmin.f32 %v878_v5, 6.0  ;;  %v910_v14 = vmin.f32 %v890_v6, 6.0  ;;  %v939_v15 = vmul.f32 0.16666667, %v919_v7  ;;  %v951_v16 = vmul.f32 0.16666667, %v931_v8 }
 0x20b   : > { %v920_v17 = vmul.f32 %v900_v9, %v840_v48  ;;  %v932_v18 = vmul.f32 %v912_v10, %v852_v49  ;;  %v937_v20 = vmul.f32 0.16666667, %v917_v11  ;;  %v949_v22 = vmul.f32 0.16666667, %v929_v12 }
 0x20c   : > { %v918_v23 = vmul.f32 %v898_v13, %v838_v53  ;;  %v930_v24 = vmul.f32 %v910_v14, %v850_v54  ;;  %979 = vst [vmem:[#allocation2 + $0x49] sm:$0xff] %v939_v15  ;;  %991 = vst [vmem:[#allocation2 + $0xd9] sm:$0xff] %v951_v16  ;;  %v816_v27 = vmul.f32 %v2101_v35, %v3191_v19  ;;  %v2670_v55 = vmov (!%p1963_p6), 0.0  }
 0x20d   : > { %v940_v25 = vmul.f32 0.16666667, %v920_v17  ;;  %v952_v26 = vmul.f32 0.16666667, %v932_v18  ;;  %v814_v28 = vmul.f32 %v3191_v19, %v752_v40  ;;  %977 = vst [vmem:[#allocation2 + $0x31] sm:$0xff] %v937_v20  ;;  %989 = vst [vmem:[#allocation2 + $0xc1] sm:$0xff] %v949_v22  ;;  %v817_v31 = vmul.f32 %v2102_v45, %v3191_v19 }
 0x20e   : > { %v938_v29 = vmul.f32 0.16666667, %v918_v23  ;;  %v950_v30 = vmul.f32 0.16666667, %v930_v24  ;;  %v815_v32 = vmul.f32 %v3191_v19, %v755_v50  ;;  %v843_v33 = vadd.f32 %v3196_v21, %v816_v27  ;;  %997 = vst [vmem:[#allocation2] sm:$0xff] (!%p1963_p6), %v2670_v55  ;;  %998 = vst [vmem:[#allocation2 + $0x8] sm:$0xff] (!%p1963_p6), %v2670_v55 }
 0x20f   : > { %980 = vst [vmem:[#allocation2 + $0x51] sm:$0xff] %v940_v25  ;;  %992 = vst [vmem:[#allocation2 + $0xe1] sm:$0xff] %v952_v26  ;;  %v841_v34 = vadd.f32 %v3196_v21, %v814_v28  ;;  %v844_v35 = vadd.f32 %v3196_v21, %v817_v31 }
 0x210   : > { %978 = vst [vmem:[#allocation2 + $0x39] sm:$0xff] %v938_v29  ;;  %990 = vst [vmem:[#allocation2 + $0xc9] sm:$0xff] %v950_v30  ;;  %v842_v36 = vadd.f32 %v3196_v21, %v815_v32  ;;  %v863_v37 = vadd.f32 3.0, %v843_v33 }
 0x211   : > { %v861_v38 = vadd.f32 3.0, %v841_v34  ;;  %v864_v39 = vadd.f32 3.0, %v844_v35  ;;  %999 = vst [vmem:[#allocation2 + $0x10] sm:$0x3] (!%p1963_p6), %v2670_v55 }
 0x212   : > { %v862_v40 = vadd.f32 3.0, %v842_v36  ;;  %v883_v41 = vmax.f32 %v863_v37, 0.0 }
 0x213   : > { %v881_v42 = vmax.f32 %v861_v38, 0.0  ;;  %v884_v43 = vmax.f32 %v864_v39, 0.0 }
 0x214   : > { %v882_v19 = vmax.f32 %v862_v40, 0.0  ;;  %v903_v44 = vmin.f32 %v883_v41, 6.0 }
 0x215   : > { %v901_v45 = vmin.f32 %v881_v42, 6.0  ;;  %v904_v46 = vmin.f32 %v884_v43, 6.0 }
 0x216   : > { %v902_v47 = vmin.f32 %v882_v19, 6.0  ;;  %v923_v48 = vmul.f32 %v903_v44, %v843_v33  ;;  %996 = sbr.rel (%p1963_p6) target bundleno = 541 (0x21d), region = 76 }
 0x217   : > { %v921_v49 = vmul.f32 %v901_v45, %v841_v34  ;;  %v924_v50 = vmul.f32 %v904_v46, %v844_v35 }
 0x218   : > { %v922_v51 = vmul.f32 %v902_v47, %v842_v36  ;;  %v943_v52 = vmul.f32 0.16666667, %v923_v48 }
 0x219   : > { %v941_v21 = vmul.f32 0.16666667, %v921_v49  ;;  %v944_v53 = vmul.f32 0.16666667, %v924_v50 }
 0x21a   : > { %v942_v54 = vmul.f32 0.16666667, %v922_v51  ;;  %983 = vst [vmem:[#allocation2 + $0x79] sm:$0xff] %v943_v52 }
 0x21b   : > { %981 = vst [vmem:[#allocation2 + $0x61] sm:$0xff] %v941_v21  ;;  %984 = vst [vmem:[#allocation2 + $0x81] sm:$0xff] %v944_v53 }
 0x21c   : > { %982 = vst [vmem:[#allocation2 + $0x69] sm:$0xff] %v942_v54 }
 0x21d PF: > { %s4012_s27 = sld [smem:[#allocation29_spill]] }
 0x223   : > { %p1964_p5 = scmp.ne.s32.totalorder %s4012_s27, 1 }
 0x224   : > { %v2671_v56 = vmov (!%p1964_p5), 0.0  }
 0x225   : > { %1003 = sbr.rel (%p1964_p5) target bundleno = 556 (0x22c), region = 80  ;;  %1005 = vst [vmem:[#allocation2 + $0xd8] sm:$0xff] (!%p1964_p5), %v2671_v56  ;;  %1006 = vst [vmem:[#allocation2 + $0xe0] sm:$0xff] (!%p1964_p5), %v2671_v56 }
 0x226   : > { %1007 = vst [vmem:[#allocation2 + $0xe8] sm:$0x3] (!%p1964_p5), %v2671_v56 }
 0x22c PF: > { %v1027_v57 = vlaneseq  ;;  %s4013_s7 = sld [smem:[#allocation86_spill]]  ;;  %v1011_v1 = vld [vmem:[#allocation2] sm:$0xff]  ;;  %v1012_v2 = vld [vmem:[#allocation2 + $0x8] sm:$0xff]  ;;  %v3262_v3 = vld [vmem:[#allocation2 + $0x18] sm:$0xff]  ;;  %s4118_s18 = sld [smem:[#allocation87_spill]] }
 0x22d   : > { %v3264_v4 = vld [vmem:[#allocation2 + $0x20] sm:$0xff]  ;;  %v3266_v5 = vld [vmem:[#allocation2 + $0x30] sm:$0xff]  ;;  %v3268_v6 = vld [vmem:[#allocation2 + $0x38] sm:$0xff]  ;;  %s4119_s4 = sld [smem:[#allocation88_spill]] }
 0x22e   : > { %v1028_v58 = vshrl.u32 %v1027_v57, 7  ;;  %v3270_v7 = vld [vmem:[#allocation2 + $0x48] sm:$0xff]  ;;  %v3272_v9 = vld [vmem:[#allocation2 + $0x50] sm:$0xff]  ;;  %v3274_v10 = vld [vmem:[#allocation2 + $0x60] sm:$0xff] }
 0x22f   : > { %v3276_v11 = vld [vmem:[#allocation2 + $0x68] sm:$0xff]  ;;  %v3278_v12 = vld [vmem:[#allocation2 + $0x78] sm:$0xff]  ;;  %v3280_v13 = vld [vmem:[#allocation2 + $0x80] sm:$0xff] }
 0x230   : > { %v1029_v62 = vsub.s32 0, %v1028_v58  ;;  %v1065_v63 = vsub.s32 1, %v1028_v58  ;;  %v3260_v0 = vsub.s32 2, %v1028_v58  ;;  %v3282_v14 = vld [vmem:[#allocation2 + $0x90] sm:$0xff]  ;;  %v3287_v17 = vld [vmem:[#allocation2 + $0x98] sm:$0xff]  ;;  %v3289_v18 = vld [vmem:[#allocation2 + $0xa8] sm:$0xff] }
 0x231   : > { %4016 = vst [vmem:[#allocation44_spill] sm:$0xff] %v3289_v18  ;;  %v3291_v20 = vld [vmem:[#allocation2 + $0xb0] sm:$0xff]  ;;  %v1047_v29 = vld [vmem:[#allocation2 + $0x1] sm:$0xff]  ;;  %v3304_v31 = vld [vmem:[#allocation2 + $0x19] sm:$0xff] }
 0x232   : > { %v1008_v59 = vld [vmem:[%s4013_s7] sm:$0x7]  ;;  %v1009_v60 = vld [vmem:[%s4013_s7 + $0x4] sm:$0x7]  ;;  %v3258_v61 = vld [vmem:[%s4013_s7 + $0x8] sm:$0x7] }
 0x233   : > { %4014 = vst [vmem:[#allocation42_spill] sm:$0xff] %v3258_v61  ;;  %4015 = vst [vmem:[#allocation43_spill] sm:$0xff] %v3260_v0  ;;  %v1030_v8 = vrot.slane %v1008_v59, %v1029_v62  ;;  %v1066_v15 = vrot.slane %v1008_v59, %v1065_v63  ;;  %v3285_v16 = vrot.slane %v1008_v59, %v3260_v0  ;;  %v1048_v30 = vld [vmem:[#allocation2 + $0x9] sm:$0xff]  ;;  %v3313_v37 = vld [vmem:[#allocation2 + $0x21] sm:$0xff] }
 0x234   : > { %4017 = vst [vmem:[#allocation45_spill] sm:$0xff] %v3291_v20  ;;  %v3293_v22 = vrot.slane %v1009_v60, %v1029_v62  ;;  %v3295_v23 = vrot.slane %v1009_v60, %v1065_v63  ;;  %v3298_v24 = vrot.slane %v1009_v60, %v3260_v0  ;;  %v3301_v25 = vrot.slane %v3258_v61, %v1029_v62  ;;  %v3315_v38 = vld [vmem:[#allocation2 + $0x31] sm:$0xff]  ;;  %v3317_v39 = vld [vmem:[#allocation2 + $0x39] sm:$0xff]  ;;  %v3323_v19 = vld [vmem:[#allocation2 + $0x49] sm:$0xff] }
 0x235   : > { %v1031_v26 = vmul.f32 %v1030_v8, %v1011_v1  ;;  %v1032_v27 = vmul.f32 %v1030_v8, %v1012_v2  ;;  %v1033_v28 = vmul.f32 %v1030_v8, %v3262_v3  ;;  %4021 = vst [vmem:[#allocation49_spill] sm:$0xff] %v3304_v31  ;;  %v3307_v32 = vrot.slane %v3258_v61, %v1065_v63  ;;  %v3325_v44 = vld [vmem:[#allocation2 + $0x51] sm:$0xff]  ;;  %v3327_v45 = vld [vmem:[#allocation2 + $0x61] sm:$0xff]  ;;  %v3333_v50 = vld [vmem:[#allocation2 + $0x69] sm:$0xff] }
 0x236   : > { %4018 = vst [vmem:[#allocation46_spill] sm:$0xff] %v3295_v23  ;;  %4019 = vst [vmem:[#allocation47_spill] sm:$0xff] %v3298_v24  ;;  %v1034_v33 = vmul.f32 %v1030_v8, %v3264_v4  ;;  %v1035_v34 = vmul.f32 %v1030_v8, %v3266_v5  ;;  %v1036_v35 = vmul.f32 %v1030_v8, %v3268_v6  ;;  %v3335_v51 = vld [vmem:[#allocation2 + $0x79] sm:$0xff]  ;;  %v3337_v52 = vld [vmem:[#allocation2 + $0x81] sm:$0xff] }
 0x237   : > { %4020 = vst [vmem:[#allocation48_spill] sm:$0xff] %v3301_v25  ;;  %4022 = vst [vmem:[#allocation50_spill] sm:$0xff] %v3307_v32  ;;  %v1037_v36 = vmul.f32 %v1030_v8, %v3270_v7  ;;  %v1038_v40 = vmul.f32 %v1030_v8, %v3272_v9  ;;  %v1039_v41 = vmul.f32 %v1030_v8, %v3274_v10  ;;  %v3340_v53 = vld [vmem:[#allocation2 + $0x91] sm:$0xff]  ;;  %v3342_v54 = vld [vmem:[#allocation2 + $0x99] sm:$0xff] }
 0x238   : > { %4023 = vst [vmem:[#allocation51_spill] sm:$0xff] %v3313_v37  ;;  %4024 = vst [vmem:[#allocation52_spill] sm:$0xff] %v3315_v38  ;;  %v1040_v42 = vmul.f32 %v1030_v8, %v3276_v11  ;;  %v1041_v43 = vmul.f32 %v1030_v8, %v3278_v12  ;;  %v1042_v46 = vmul.f32 %v1030_v8, %v3280_v13  ;;  %v3344_v55 = vld [vmem:[#allocation2 + $0xa9] sm:$0xff]  ;;  %v3347_v59 = vld [vmem:[#allocation2 + $0xb1] sm:$0xff] }
 0x239   : > { %4025 = vst [vmem:[#allocation53_spill] sm:$0xff] %v3317_v39  ;;  %4026 = vst [vmem:[#allocation54_spill] sm:$0xff] %v3323_v19  ;;  %v1043_v47 = vmul.f32 %v1030_v8, %v3282_v14  ;;  %v1044_v48 = vmul.f32 %v1030_v8, %v3287_v17  ;;  %v1045_v49 = vmul.f32 %v1030_v8, %v3289_v18 }
 0x23a   : > { %4027 = vst [vmem:[#allocation55_spill] sm:$0xff] %v3325_v44  ;;  %4028 = vst [vmem:[#allocation56_spill] sm:$0xff] %v3327_v45  ;;  %v1046_v21 = vmul.f32 %v1030_v8, %v3291_v20  ;;  %v1067_v56 = vmul.f32 %v1066_v15, %v1047_v29  ;;  %v1068_v57 = vmul.f32 %v1066_v15, %v1048_v30 }
 0x23b   : > { %4029 = vst [vmem:[#allocation57_spill] sm:$0xff] %v3333_v50  ;;  %4030 = vst [vmem:[#allocation58_spill] sm:$0xff] %v3335_v51  ;;  %v1069_v58 = vmul.f32 %v1066_v15, %v3304_v31  ;;  %v1070_v60 = vmul.f32 %v1066_v15, %v3313_v37  ;;  %v1071_v62 = vmul.f32 %v1066_v15, %v3315_v38  ;;  %v1100_v37 = vld [vmem:[#allocation2 + $0xa] sm:$0xff] }
 0x23c   : > { %4031 = vst [vmem:[#allocation59_spill] sm:$0xff] %v3337_v52  ;;  %4032 = vst [vmem:[#allocation60_spill] sm:$0xff] %v3340_v53  ;;  %v1072_v63 = vmul.f32 %v1066_v15, %v3317_v39  ;;  %v1073_v1 = vmul.f32 %v1066_v15, %v3323_v19  ;;  %v1074_v2 = vmul.f32 %v1066_v15, %v3325_v44  ;;  %v1099_v44 = vld [vmem:[#allocation2 + $0x2] sm:$0xff] }
 0x23d   : > { %4033 = vst [vmem:[#allocation61_spill] sm:$0xff] %v3342_v54  ;;  %4034 = vst [vmem:[#allocation62_spill] sm:$0xff] %v3344_v55  ;;  %v1075_v8 = vmul.f32 %v1066_v15, %v3327_v45  ;;  %v1076_v61 = vmul.f32 %v1066_v15, %v3333_v50  ;;  %v1077_v29 = vmul.f32 %v1066_v15, %v3335_v51  ;;  %v3362_v45 = vld [vmem:[#allocation2 + $0x1a] sm:$0xff] }
 0x23e   : > { %4035 = vst [vmem:[#allocation63_spill] sm:$0xff] %v3347_v59  ;;  %v1078_v30 = vmul.f32 %v1066_v15, %v3337_v52  ;;  %v1079_v0 = vmul.f32 %v1066_v15, %v3340_v53  ;;  %v1080_v32 = vmul.f32 %v1066_v15, %v3342_v54  ;;  %v1081_v25 = vmul.f32 %v1066_v15, %v3344_v55  ;;  %v3364_v52 = vld [vmem:[#allocation2 + $0x22] sm:$0xff]  ;;  %v3366_v53 = vld [vmem:[#allocation2 + $0x32] sm:$0xff]  ;;  %v3368_v54 = vld [vmem:[#allocation2 + $0x3a] sm:$0xff] }
 0x23f   : > { %v1082_v24 = vmul.f32 %v1066_v15, %v3347_v59  ;;  %v1083_v39 = vadd.f32 %v1067_v56, %v1031_v26  ;;  %v1084_v19 = vadd.f32 %v1068_v57, %v1032_v27  ;;  %v1085_v38 = vadd.f32 %v1069_v58, %v1033_v28  ;;  %4036 = vst [vmem:[#allocation64_spill] sm:$0xff] %v3362_v45  ;;  %v3370_v27 = vld [vmem:[#allocation2 + $0x4a] sm:$0xff]  ;;  %v3372_v28 = vld [vmem:[#allocation2 + $0x52] sm:$0xff]  ;;  %v3374_v56 = vld [vmem:[#allocation2 + $0x62] sm:$0xff] }
 0x240   : > { %v1086_v50 = vadd.f32 %v1070_v60, %v1034_v33  ;;  %v1087_v23 = vadd.f32 %v1071_v62, %v1035_v34  ;;  %v1088_v51 = vadd.f32 %v1072_v63, %v1036_v35  ;;  %v1089_v31 = vadd.f32 %v1073_v1, %v1037_v36  ;;  %4037 = vst [vmem:[#allocation65_spill] sm:$0xff] %v3364_v52  ;;  %v3376_v57 = vld [vmem:[#allocation2 + $0x6a] sm:$0xff]  ;;  %v3378_v58 = vld [vmem:[#allocation2 + $0x7a] sm:$0xff]  ;;  %v3380_v60 = vld [vmem:[#allocation2 + $0x82] sm:$0xff] }
 0x241   : > { %4038 = vst [vmem:[#allocation66_spill] sm:$0xff] %v3366_v53  ;;  %4039 = vst [vmem:[#allocation67_spill] sm:$0xff] %v3368_v54  ;;  %v1090_v55 = vadd.f32 %v1074_v2, %v1038_v40  ;;  %v1091_v20 = vadd.f32 %v1075_v8, %v1039_v41  ;;  %v1092_v15 = vadd.f32 %v1076_v61, %v1040_v42  ;;  %v3382_v41 = vld [vmem:[#allocation2 + $0x92] sm:$0xff]  ;;  %v3384_v61 = vld [vmem:[#allocation2 + $0x9a] sm:$0xff] }
 0x242   : > { %v1093_v26 = vadd.f32 %v1077_v29, %v1041_v43  ;;  %4040 = vst [vmem:[#allocation68_spill] sm:$0xff] %v3370_v27  ;;  %4041 = vst [vmem:[#allocation69_spill] sm:$0xff] %v3372_v28  ;;  %v1094_v33 = vadd.f32 %v1078_v30, %v1042_v46  ;;  %v1095_v34 = vadd.f32 %v1079_v0, %v1043_v47  ;;  %v3386_v42 = vld [vmem:[#allocation2 + $0xaa] sm:$0xff] }
 0x243   : > { %4042 = vst [vmem:[#allocation70_spill] sm:$0xff] %v3374_v56  ;;  %v1096_v35 = vadd.f32 %v1080_v32, %v1044_v48  ;;  %v1097_v36 = vadd.f32 %v1081_v25, %v1045_v49  ;;  %4043 = vst [vmem:[#allocation71_spill] sm:$0xff] %v3376_v57  ;;  %v1098_v40 = vadd.f32 %v1082_v24, %v1046_v21  ;;  %v3392_v25 = vld [vmem:[#allocation2 + $0xb2] sm:$0xff] }
 0x244   : > { %4044 = vst [vmem:[#allocation72_spill] sm:$0xff] %v3378_v58  ;;  %4045 = vst [vmem:[#allocation73_spill] sm:$0xff] %v3380_v60  ;;  %v1119_v43 = vmul.f32 %v3285_v16, %v1099_v44  ;;  %v1120_v46 = vmul.f32 %v3285_v16, %v1100_v37  ;;  %v1121_v0 = vmul.f32 %v3285_v16, %v3362_v45 }
 0x245   : > { %4046 = vst [vmem:[#allocation74_spill] sm:$0xff] %v3382_v41  ;;  %4047 = vst [vmem:[#allocation75_spill] sm:$0xff] %v3384_v61  ;;  %v1122_v32 = vmul.f32 %v3285_v16, %v3364_v52  ;;  %v1123_v24 = vmul.f32 %v3285_v16, %v3366_v53  ;;  %v1124_v47 = vmul.f32 %v3285_v16, %v3368_v54 }
 0x246   : > { %4048 = vst [vmem:[#allocation76_spill] sm:$0xff] %v3386_v42  ;;  %4049 = vst [vmem:[#allocation77_spill] sm:$0xff] %v3392_v25  ;;  %v1125_v48 = vmul.f32 %v3285_v16, %v3370_v27  ;;  %v1126_v37 = vmul.f32 %v3285_v16, %v3372_v28  ;;  %v1127_v44 = vmul.f32 %v3285_v16, %v3374_v56 }
 0x247   : > { %v1128_v49 = vmul.f32 %v3285_v16, %v3376_v57  ;;  %v1129_v21 = vmul.f32 %v3285_v16, %v3378_v58  ;;  %v1130_v62 = vmul.f32 %v3285_v16, %v3380_v60  ;;  %v1131_v63 = vmul.f32 %v3285_v16, %v3382_v41 }
 0x248   : > { %v1132_v1 = vmul.f32 %v3285_v16, %v3384_v61  ;;  %v1133_v2 = vmul.f32 %v3285_v16, %v3386_v42  ;;  %v1134_v8 = vmul.f32 %v3285_v16, %v3392_v25  ;;  %v1135_v29 = vadd.f32 %v1119_v43, %v1083_v39  ;;  %v3420_v42 = vld [vmem:[#allocation2 + $0xc0] sm:$0xff] }
 0x249   : > { %v1136_v30 = vadd.f32 %v1120_v46, %v1084_v19  ;;  %v1137_v57 = vadd.f32 %v1121_v0, %v1085_v38  ;;  %v1138_v56 = vadd.f32 %v1122_v32, %v1086_v50  ;;  %v1139_v58 = vadd.f32 %v1123_v24, %v1087_v23  ;;  %4050 = vst [vmem:[#allocation78_spill] sm:$0xff] %v3420_v42 }
 0x24a   : > { %v1140_v28 = vadd.f32 %v1124_v47, %v1088_v51  ;;  %v1141_v27 = vadd.f32 %v1125_v48, %v1089_v31  ;;  %v1142_v60 = vadd.f32 %v1126_v37, %v1090_v55  ;;  %v1143_v54 = vadd.f32 %v1127_v44, %v1091_v20  ;;  %v3428_v31 = vld [vmem:[#allocation2 + $0xc8] sm:$0xff] }
 0x24b   : > { %v1144_v53 = vadd.f32 %v1128_v49, %v1092_v15  ;;  %v1145_v41 = vadd.f32 %v1129_v21, %v1093_v26  ;;  %v1146_v52 = vadd.f32 %v1130_v62, %v1094_v33  ;;  %v1147_v45 = vadd.f32 %v1131_v63, %v1095_v34  ;;  %4051 = vst [vmem:[#allocation79_spill] sm:$0xff] %v3428_v31  ;;  %v4052_v26 = vld [vmem:[#allocation44_spill] sm:$0xff]  ;;  %v4053_v34 = vld [vmem:[#allocation45_spill] sm:$0xff] }
 0x24c   : > { %v1148_v61 = vadd.f32 %v1132_v1, %v1096_v35  ;;  %v1149_v59 = vadd.f32 %v1133_v2, %v1097_v36  ;;  %v1150_v18 = vadd.f32 %v1134_v8, %v1098_v40  ;;  %v1172_v16 = vmul.f32 %v3293_v22, %v3262_v3 }
 0x24d   : > { %v1173_v38 = vmul.f32 %v3293_v22, %v3264_v4  ;;  %v1174_v23 = vmul.f32 %v3293_v22, %v3266_v5  ;;  %v1175_v20 = vmul.f32 %v3293_v22, %v3268_v6  ;;  %v1176_v39 = vmul.f32 %v3293_v22, %v3270_v7 }
 0x24e   : > { %v1177_v19 = vmul.f32 %v3293_v22, %v3272_v9  ;;  %v1178_v3 = vmul.f32 %v3293_v22, %v3274_v10  ;;  %v1179_v4 = vmul.f32 %v3293_v22, %v3276_v11  ;;  %v1180_v50 = vmul.f32 %v3293_v22, %v3278_v12 }
 0x24f   : > { %v1181_v51 = vmul.f32 %v3293_v22, %v3280_v13  ;;  %v1182_v55 = vmul.f32 %v3293_v22, %v3282_v14  ;;  %v1183_v15 = vmul.f32 %v3293_v22, %v3287_v17  ;;  %v1184_v33 = vmul.f32 %v3293_v22, %v4052_v26 }
 0x250   : > { %v1185_v35 = vmul.f32 %v3293_v22, %v4053_v34  ;;  %v1186_v36 = vmul.f32 %v3293_v22, %v3420_v42  ;;  %v1187_v40 = vmul.f32 %v3293_v22, %v3428_v31  ;;  %v1188_v43 = vadd.f32 %v1172_v16, %v1135_v29  ;;  %v3456_v42 = vld [vmem:[#allocation2 + $0xc1] sm:$0xff]  ;;  %v4055_v34 = vld [vmem:[#allocation49_spill] sm:$0xff]  ;;  %v4056_v22 = vld [vmem:[#allocation46_spill] sm:$0xff] }
 0x251   : > { %v1189_v46 = vadd.f32 %v1173_v38, %v1136_v30  ;;  %v1190_v0 = vadd.f32 %v1174_v23, %v1137_v57  ;;  %v1191_v32 = vadd.f32 %v1175_v20, %v1138_v56  ;;  %v1192_v24 = vadd.f32 %v1176_v39, %v1139_v58  ;;  %4054 = vst [vmem:[#allocation44_spill] sm:$0xff] %v3456_v42  ;;  %v4057_v30 = vld [vmem:[#allocation51_spill] sm:$0xff]  ;;  %v4058_v57 = vld [vmem:[#allocation52_spill] sm:$0xff]  ;;  %v4064_v16 = vld [vmem:[#allocation58_spill] sm:$0xff] }
 0x252   : > { %v1193_v47 = vadd.f32 %v1177_v19, %v1140_v28  ;;  %v1194_v48 = vadd.f32 %v1178_v3, %v1141_v27  ;;  %v1195_v37 = vadd.f32 %v1179_v4, %v1142_v60  ;;  %v1196_v44 = vadd.f32 %v1180_v50, %v1143_v54  ;;  %v3464_v28 = vld [vmem:[#allocation2 + $0xc9] sm:$0xff]  ;;  %v4065_v23 = vld [vmem:[#allocation59_spill] sm:$0xff]  ;;  %v4068_v50 = vld [vmem:[#allocation62_spill] sm:$0xff] }
 0x253   : > { %v1197_v49 = vadd.f32 %v1181_v51, %v1144_v53  ;;  %v1198_v21 = vadd.f32 %v1182_v55, %v1145_v41  ;;  %v1199_v62 = vadd.f32 %v1183_v15, %v1146_v52  ;;  %v1200_v63 = vadd.f32 %v1184_v33, %v1147_v45  ;;  %v4059_v53 = vld [vmem:[#allocation53_spill] sm:$0xff]  ;;  %v4060_v45 = vld [vmem:[#allocation54_spill] sm:$0xff]  ;;  %v4062_v58 = vld [vmem:[#allocation56_spill] sm:$0xff] }
 0x254   : > { %v1201_v1 = vadd.f32 %v1185_v35, %v1148_v61  ;;  %v1202_v2 = vadd.f32 %v1186_v36, %v1149_v59  ;;  %v1203_v8 = vadd.f32 %v1187_v40, %v1150_v18  ;;  %v1224_v29 = vmul.f32 %v4056_v22, %v4055_v34  ;;  %v4061_v18 = vld [vmem:[#allocation55_spill] sm:$0xff]  ;;  %v4063_v41 = vld [vmem:[#allocation57_spill] sm:$0xff]  ;;  %v4066_v39 = vld [vmem:[#allocation60_spill] sm:$0xff] }
 0x255   : > { %v1225_v56 = vmul.f32 %v4056_v22, %v4057_v30  ;;  %v1226_v27 = vmul.f32 %v4056_v22, %v4058_v57  ;;  %v1227_v52 = vmul.f32 %v4056_v22, %v4059_v53  ;;  %v1228_v54 = vmul.f32 %v4056_v22, %v4060_v45  ;;  %v4067_v3 = vld [vmem:[#allocation61_spill] sm:$0xff]  ;;  %v4069_v55 = vld [vmem:[#allocation63_spill] sm:$0xff]  ;;  %v4071_v31 = vld [vmem:[#allocation64_spill] sm:$0xff] }
 0x256   : > { %v1229_v59 = vmul.f32 %v4056_v22, %v4061_v18  ;;  %v1230_v60 = vmul.f32 %v4056_v22, %v4062_v58  ;;  %v1231_v61 = vmul.f32 %v4056_v22, %v4063_v41  ;;  %v1232_v38 = vmul.f32 %v4056_v22, %v4064_v16 }
 0x257   : > { %v1233_v20 = vmul.f32 %v4056_v22, %v4065_v23  ;;  %v1234_v19 = vmul.f32 %v4056_v22, %v4066_v39  ;;  %v1235_v4 = vmul.f32 %v4056_v22, %v4067_v3  ;;  %v1236_v51 = vmul.f32 %v4056_v22, %v4068_v50 }
 0x258   : > { %v1237_v15 = vmul.f32 %v4056_v22, %v4069_v55  ;;  %v1238_v33 = vmul.f32 %v4056_v22, %v3456_v42  ;;  %v1239_v34 = vmul.f32 %v4056_v22, %v3464_v28  ;;  %v1240_v35 = vadd.f32 %v1224_v29, %v1188_v43  ;;  %v3492_v42 = vld [vmem:[#allocation2 + $0xc2] sm:$0xff]  ;;  %v4072_v22 = vld [vmem:[#allocation47_spill] sm:$0xff] }
 0x259   : > { %v1241_v36 = vadd.f32 %v1225_v56, %v1189_v46  ;;  %v1242_v40 = vadd.f32 %v1226_v27, %v1190_v0  ;;  %v1243_v30 = vadd.f32 %v1227_v52, %v1191_v32  ;;  %v1244_v39 = vadd.f32 %v1228_v54, %v1192_v24  ;;  %4070 = vst [vmem:[#allocation49_spill] sm:$0xff] %v3492_v42  ;;  %v4073_v46 = vld [vmem:[#allocation65_spill] sm:$0xff]  ;;  %v4074_v32 = vld [vmem:[#allocation66_spill] sm:$0xff] }
 0x25a   : > { %v1245_v23 = vadd.f32 %v1229_v59, %v1193_v47  ;;  %v1246_v16 = vadd.f32 %v1230_v60, %v1194_v48  ;;  %v1247_v3 = vadd.f32 %v1231_v61, %v1195_v37  ;;  %v1248_v41 = vadd.f32 %v1232_v38, %v1196_v44  ;;  %v3500_v47 = vld [vmem:[#allocation2 + $0xca] sm:$0xff]  ;;  %v4075_v48 = vld [vmem:[#allocation67_spill] sm:$0xff]  ;;  %v4076_v44 = vld [vmem:[#allocation68_spill] sm:$0xff] }
 0x25b   : > { %v1249_v58 = vadd.f32 %v1233_v20, %v1197_v49  ;;  %v1250_v50 = vadd.f32 %v1234_v19, %v1198_v21  ;;  %v1251_v18 = vadd.f32 %v1235_v4, %v1199_v62  ;;  %v1252_v45 = vadd.f32 %v1236_v51, %v1200_v63  ;;  %v4077_v21 = vld [vmem:[#allocation69_spill] sm:$0xff]  ;;  %v4078_v63 = vld [vmem:[#allocation70_spill] sm:$0xff]  ;;  %v4083_v59 = vld [vmem:[#allocation75_spill] sm:$0xff] }
 0x25c   : > { %v1253_v55 = vadd.f32 %v1237_v15, %v1201_v1  ;;  %v1254_v53 = vadd.f32 %v1238_v33, %v1202_v2  ;;  %v1255_v57 = vadd.f32 %v1239_v34, %v1203_v8  ;;  %v1276_v43 = vmul.f32 %v4072_v22, %v4071_v31  ;;  %v4079_v1 = vld [vmem:[#allocation71_spill] sm:$0xff]  ;;  %v4080_v8 = vld [vmem:[#allocation72_spill] sm:$0xff]  ;;  %v4081_v56 = vld [vmem:[#allocation73_spill] sm:$0xff] }
 0x25d   : > { %v1277_v0 = vmul.f32 %v4072_v22, %v4073_v46  ;;  %v1278_v24 = vmul.f32 %v4072_v22, %v4074_v32  ;;  %v1279_v37 = vmul.f32 %v4072_v22, %v4075_v48  ;;  %v1280_v49 = vmul.f32 %v4072_v22, %v4076_v44  ;;  %v4082_v52 = vld [vmem:[#allocation74_spill] sm:$0xff]  ;;  %v4084_v61 = vld [vmem:[#allocation76_spill] sm:$0xff] }
 0x25e   : > { %v1281_v62 = vmul.f32 %v4072_v22, %v4077_v21  ;;  %v1282_v31 = vmul.f32 %v4072_v22, %v4078_v63  ;;  %v1283_v2 = vmul.f32 %v4072_v22, %v4079_v1  ;;  %v1284_v29 = vmul.f32 %v4072_v22, %v4080_v8  ;;  %v4085_v32 = vld [vmem:[#allocation48_spill] sm:$0xff] }
 0x25f   : > { %v1285_v27 = vmul.f32 %v4072_v22, %v4081_v56  ;;  %v1286_v54 = vmul.f32 %v4072_v22, %v4082_v52  ;;  %v1287_v60 = vmul.f32 %v4072_v22, %v4083_v59  ;;  %v1288_v38 = vmul.f32 %v4072_v22, %v4084_v61 }
 0x260   : > { %v1289_v20 = vmul.f32 %v4072_v22, %v3392_v25  ;;  %v1290_v19 = vmul.f32 %v4072_v22, %v3492_v42  ;;  %v1291_v4 = vmul.f32 %v4072_v22, %v3500_v47  ;;  %v1292_v51 = vadd.f32 %v1276_v43, %v1240_v35  ;;  %v1323_v42 = vld [vmem:[#allocation2 + $0xd8] sm:$0xff] }
 0x261   : > { %v1293_v15 = vadd.f32 %v1277_v0, %v1241_v36  ;;  %v1294_v33 = vadd.f32 %v1278_v24, %v1242_v40  ;;  %v1295_v34 = vadd.f32 %v1279_v37, %v1243_v30  ;;  %v1296_v46 = vadd.f32 %v1280_v49, %v1244_v39  ;;  %v4088_v39 = vld [vmem:[#allocation79_spill] sm:$0xff] }
 0x262   : > { %v1297_v52 = vadd.f32 %v1281_v62, %v1245_v23  ;;  %v1298_v56 = vadd.f32 %v1282_v31, %v1246_v16  ;;  %v1299_v59 = vadd.f32 %v1283_v2, %v1247_v3  ;;  %v1300_v8 = vadd.f32 %v1284_v29, %v1248_v41  ;;  %v1324_v16 = vld [vmem:[#allocation2 + $0xe0] sm:$0xff]  ;;  %v4087_v41 = vld [vmem:[#allocation78_spill] sm:$0xff] }
 0x263   : > { %v1301_v1 = vadd.f32 %v1285_v27, %v1249_v58  ;;  %v1302_v61 = vadd.f32 %v1286_v54, %v1250_v50  ;;  %v1303_v63 = vadd.f32 %v1287_v60, %v1251_v18  ;;  %v1304_v21 = vadd.f32 %v1288_v38, %v1252_v45  ;;  %v4086_v18 = vld [vmem:[#allocation45_spill] sm:$0xff]  ;;  %v1375_v29 = vld [vmem:[#allocation2 + $0xd9] sm:$0xff] }
 0x264   : > { %v1305_v25 = vadd.f32 %v1289_v20, %v1253_v55  ;;  %v1306_v44 = vadd.f32 %v1290_v19, %v1254_v53  ;;  %v1307_v48 = vadd.f32 %v1291_v4, %v1255_v57  ;;  %v1329_v22 = vmul.f32 %v4085_v32, %v3266_v5  ;;  %v4090_v27 = vld [vmem:[#allocation50_spill] sm:$0xff]  ;;  %v4091_v54 = vld [vmem:[#allocation53_spill] sm:$0xff]  ;;  %v4098_v19 = vld [vmem:[#allocation60_spill] sm:$0xff] }
 0x265   : > { %v1330_v35 = vmul.f32 %v4085_v32, %v3268_v6  ;;  %v1331_v23 = vmul.f32 %v4085_v32, %v3270_v7  ;;  %v1332_v58 = vmul.f32 %v4085_v32, %v3272_v9  ;;  %v1333_v45 = vmul.f32 %v4085_v32, %v3274_v10  ;;  %v4092_v38 = vld [vmem:[#allocation54_spill] sm:$0xff] }
 0x266   : > { %v1334_v57 = vmul.f32 %v4085_v32, %v3276_v11  ;;  %v1335_v53 = vmul.f32 %v4085_v32, %v3278_v12  ;;  %v1336_v5 = vmul.f32 %v4085_v32, %v3280_v13  ;;  %v1337_v6 = vmul.f32 %v4085_v32, %v3282_v14 }
 0x267   : > { %v1338_v7 = vmul.f32 %v4085_v32, %v3287_v17  ;;  %v1339_v9 = vmul.f32 %v4085_v32, %v4052_v26  ;;  %v1340_v10 = vmul.f32 %v4085_v32, %v4086_v18  ;;  %v1341_v11 = vmul.f32 %v4085_v32, %v4087_v41 }
 0x268   : > { %v1342_v12 = vmul.f32 %v4085_v32, %v4088_v39  ;;  %v1343_v13 = vmul.f32 %v4085_v32, %v1323_v42  ;;  %v1344_v3 = vmul.f32 %v4085_v32, %v1324_v16  ;;  %v1345_v14 = vadd.f32 %v1329_v22, %v1292_v51  ;;  %v4089_v42 = vld [vmem:[#allocation52_spill] sm:$0xff]  ;;  %v4099_v51 = vld [vmem:[#allocation61_spill] sm:$0xff]  ;;  %v4103_v39 = vld [vmem:[#allocation43_spill] sm:$0xff] }
 0x269   : > { %v1346_v50 = vadd.f32 %v1330_v35, %v1293_v15  ;;  %v1347_v55 = vadd.f32 %v1331_v23, %v1294_v33  ;;  %v1348_v17 = vadd.f32 %v1332_v58, %v1295_v34  ;;  %v1349_v36 = vadd.f32 %v1333_v45, %v1296_v46  ;;  %v4100_v33 = vld [vmem:[#allocation62_spill] sm:$0xff]  ;;  %v4101_v46 = vld [vmem:[#allocation63_spill] sm:$0xff]  ;;  %v4102_v35 = vld [vmem:[#allocation44_spill] sm:$0xff] }
 0x26a   : > { %v1350_v40 = vadd.f32 %v1334_v57, %v1297_v52  ;;  %v1351_v26 = vadd.f32 %v1335_v53, %v1298_v56  ;;  %v1352_v30 = vadd.f32 %v1336_v5, %v1299_v59  ;;  %v1353_v43 = vadd.f32 %v1337_v6, %v1300_v8  ;;  %v1376_v56 = vld [vmem:[#allocation2 + $0xe1] sm:$0xff] }
 0x26b   : > { %v1354_v0 = vadd.f32 %v1338_v7, %v1301_v1  ;;  %v1355_v24 = vadd.f32 %v1339_v9, %v1302_v61  ;;  %v1356_v37 = vadd.f32 %v1340_v10, %v1303_v63  ;;  %v1357_v49 = vadd.f32 %v1341_v11, %v1304_v21  ;;  %v4093_v59 = vld [vmem:[#allocation55_spill] sm:$0xff]  ;;  %v4094_v8 = vld [vmem:[#allocation56_spill] sm:$0xff] }
 0x26c   : > { %v1358_v62 = vadd.f32 %v1342_v12, %v1305_v25  ;;  %v1359_v31 = vadd.f32 %v1343_v13, %v1306_v44  ;;  %v1360_v2 = vadd.f32 %v1344_v3, %v1307_v48  ;;  %v1381_v32 = vmul.f32 %v4090_v27, %v4089_v42  ;;  %v4095_v25 = vld [vmem:[#allocation57_spill] sm:$0xff]  ;;  %v4096_v44 = vld [vmem:[#allocation58_spill] sm:$0xff]  ;;  %v4097_v61 = vld [vmem:[#allocation59_spill] sm:$0xff] }
 0x26d   : > { %v1382_v60 = vmul.f32 %v4090_v27, %v4091_v54  ;;  %v1383_v52 = vmul.f32 %v4090_v27, %v4092_v38  ;;  %v1384_v1 = vmul.f32 %v4090_v27, %v4093_v59  ;;  %v1385_v21 = vmul.f32 %v4090_v27, %v4094_v8  ;;  %v4104_v12 = vld [vmem:[#allocation42_spill] sm:$0xff]  ;;  %v4114_v59 = vld [vmem:[#allocation75_spill] sm:$0xff]  ;;  %v4115_v8 = vld [vmem:[#allocation76_spill] sm:$0xff] }
 0x26e   : > { %v1386_v48 = vmul.f32 %v4090_v27, %v4095_v25  ;;  %v1387_v63 = vmul.f32 %v4090_v27, %v4096_v44  ;;  %v1388_v20 = vmul.f32 %v4090_v27, %v4097_v61  ;;  %v1389_v4 = vmul.f32 %v4090_v27, %v4098_v19  ;;  %v4105_v38 = vld [vmem:[#allocation66_spill] sm:$0xff]  ;;  %v4116_v25 = vld [vmem:[#allocation77_spill] sm:$0xff] }
 0x26f   : > { %v1390_v15 = vmul.f32 %v4090_v27, %v4099_v51  ;;  %v1391_v34 = vmul.f32 %v4090_v27, %v4100_v33  ;;  %v1392_v22 = vmul.f32 %v4090_v27, %v4101_v46  ;;  %v1393_v23 = vmul.f32 %v4090_v27, %v4102_v35  ;;  %v1965_v46 = vld [vmem:[%s4118_s18] ss:$0 sm:$0xff] }
 0x270   : > { %v1394_v16 = vmul.f32 %v4090_v27, %v3464_v28  ;;  %v1395_v58 = vmul.f32 %v4090_v27, %v1375_v29  ;;  %v1396_v45 = vmul.f32 %v4090_v27, %v1376_v56  ;;  %v1397_v57 = vadd.f32 %v1381_v32, %v1345_v14  ;;  %v4106_v14 = vld [vmem:[#allocation67_spill] sm:$0xff] }
 0x271   : > { %v1398_v53 = vadd.f32 %v1382_v60, %v1346_v50  ;;  %v1399_v5 = vadd.f32 %v1383_v52, %v1347_v55  ;;  %v1400_v6 = vadd.f32 %v1384_v1, %v1348_v17  ;;  %v1401_v7 = vadd.f32 %v1385_v21, %v1349_v36  ;;  %v4107_v55 = vld [vmem:[#allocation68_spill] sm:$0xff]  ;;  %v4110_v32 = vld [vmem:[#allocation71_spill] sm:$0xff] }
 0x272   : > { %v1402_v9 = vadd.f32 %v1386_v48, %v1350_v40  ;;  %v1403_v18 = vadd.f32 %v1387_v63, %v1351_v26  ;;  %v1404_v10 = vadd.f32 %v1388_v20, %v1352_v30  ;;  %v1405_v41 = vadd.f32 %v1389_v4, %v1353_v43  ;;  %v1427_v40 = vld [vmem:[#allocation2 + $0xda] sm:$0xff]  ;;  %v4108_v26 = vld [vmem:[#allocation69_spill] sm:$0xff]  ;;  %v4109_v43 = vld [vmem:[#allocation70_spill] sm:$0xff] }
 0x273   : > { %v1406_v11 = vadd.f32 %v1390_v15, %v1354_v0  ;;  %v1432_v13 = vrot.slane %v4104_v12, %v4103_v39  ;;  %v1407_v3 = vadd.f32 %v1391_v34, %v1355_v24  ;;  %v1408_v42 = vadd.f32 %v1392_v22, %v1356_v37  ;;  %v1428_v52 = vld [vmem:[#allocation2 + $0xe2] sm:$0xff]  ;;  %v4117_v48 = vld [vmem:[#allocation49_spill] sm:$0xff] }
 0x274   : > { %v1409_v28 = vadd.f32 %v1393_v23, %v1357_v49  ;;  %v1410_v54 = vadd.f32 %v1394_v16, %v1358_v62  ;;  %v1411_v29 = vadd.f32 %v1395_v58, %v1359_v31  ;;  %v1412_v36 = vadd.f32 %v1396_v45, %v1360_v2  ;;  %v4111_v24 = vld [vmem:[#allocation72_spill] sm:$0xff]  ;;  %v4112_v49 = vld [vmem:[#allocation73_spill] sm:$0xff]  ;;  %v4113_v31 = vld [vmem:[#allocation74_spill] sm:$0xff] }
 0x275   : > { %v1433_v27 = vmul.f32 %v1432_v13, %v4105_v38  ;;  %v1434_v50 = vmul.f32 %v1432_v13, %v4106_v14  ;;  %v1435_v17 = vmul.f32 %v1432_v13, %v4107_v55  ;;  %v1436_v30 = vmul.f32 %v1432_v13, %v4108_v26  ;;  %v1966_v38 = vld [vmem:[%s4119_s4] ss:$0 sm:$0xff] }
 0x276   : > { %v1437_v0 = vmul.f32 %v1432_v13, %v4109_v43  ;;  %v1438_v60 = vmul.f32 %v1432_v13, %v4110_v32  ;;  %v1439_v37 = vmul.f32 %v1432_v13, %v4111_v24  ;;  %v1440_v62 = vmul.f32 %v1432_v13, %v4112_v49 }
 0x277   : > { %v1441_v56 = vmul.f32 %v1432_v13, %v4113_v31  ;;  %v1442_v1 = vmul.f32 %v1432_v13, %v4114_v59  ;;  %v1443_v21 = vmul.f32 %v1432_v13, %v4115_v8  ;;  %v1444_v2 = vmul.f32 %v1432_v13, %v4116_v25 }
 0x278   : > { %v1445_v44 = vmul.f32 %v1432_v13, %v4117_v48  ;;  %v1446_v63 = vmul.f32 %v1432_v13, %v3500_v47  ;;  %v1447_v61 = vmul.f32 %v1432_v13, %v1427_v40  ;;  %v1449_v20 = vadd.f32 %v1433_v27, %v1397_v57 }
 0x279   : > { %v1450_v19 = vadd.f32 %v1434_v50, %v1398_v53  ;;  %v1451_v4 = vadd.f32 %v1435_v17, %v1399_v5  ;;  %v1448_v51 = vmul.f32 %v1432_v13, %v1428_v52  ;;  %v1452_v15 = vadd.f32 %v1436_v30, %v1400_v6 }
 0x27a   : > { %v1453_v33 = vadd.f32 %v1437_v0, %v1401_v7  ;;  %v1454_v34 = vadd.f32 %v1438_v60, %v1402_v9  ;;  %v1455_v22 = vadd.f32 %v1439_v37, %v1403_v18  ;;  %v1456_v35 = vadd.f32 %v1440_v62, %v1404_v10 }
 0x27b   : > { %v1457_v23 = vadd.f32 %v1441_v56, %v1405_v41  ;;  %v1458_v16 = vadd.f32 %v1442_v1, %v1406_v11  ;;  %v1459_v58 = vadd.f32 %v1443_v21, %v1407_v3  ;;  %v1460_v45 = vadd.f32 %v1444_v2, %v1408_v42 }
 0x27c   : > { %v1461_v39 = vadd.f32 %v1445_v44, %v1409_v28  ;;  %v1462_v47 = vadd.f32 %v1446_v63, %v1410_v54  ;;  %v1463_v12 = vadd.f32 %v1447_v61, %v1411_v29  ;;  %v1472_v57 = vmul.f32 %v1965_v46, %v1449_v20 }
 0x27d   : > { %v1473_v53 = vmul.f32 %v1965_v46, %v1450_v19  ;;  %v1474_v5 = vmul.f32 %v1965_v46, %v1451_v4  ;;  %v1464_v13 = vadd.f32 %v1448_v51, %v1412_v36  ;;  %v1475_v6 = vmul.f32 %v1965_v46, %v1452_v15 }
 0x27e   : > { %v1476_v7 = vmul.f32 %v1965_v46, %v1453_v33  ;;  %v1477_v9 = vmul.f32 %v1965_v46, %v1454_v34  ;;  %v1478_v18 = vmul.f32 %v1965_v46, %v1455_v22  ;;  %v1479_v10 = vmul.f32 %v1965_v46, %v1456_v35 }
 0x27f   : > { %v1480_v41 = vmul.f32 %v1965_v46, %v1457_v23  ;;  %v1481_v11 = vmul.f32 %v1965_v46, %v1458_v16  ;;  %v1482_v3 = vmul.f32 %v1965_v46, %v1459_v58  ;;  %v1483_v42 = vmul.f32 %v1965_v46, %v1460_v45 }
 0x280   : > { %v1484_v28 = vmul.f32 %v1965_v46, %v1461_v39  ;;  %v1485_v54 = vmul.f32 %v1965_v46, %v1462_v47  ;;  %v1486_v29 = vmul.f32 %v1965_v46, %v1463_v12  ;;  %v3610_v27 = vadd.f32 %v1966_v38, %v1472_v57 }
 0x281   : > { %v3612_v14 = vadd.f32 %v1966_v38, %v1473_v53  ;;  %v3614_v50 = vadd.f32 %v1966_v38, %v1474_v5  ;;  %v1487_v55 = vmul.f32 %v1965_v46, %v1464_v13  ;;  %v3616_v17 = vadd.f32 %v1966_v38, %v1475_v6 }
 0x282   : > { %v3618_v36 = vadd.f32 %v1966_v38, %v1476_v7  ;;  %v3620_v40 = vadd.f32 %v1966_v38, %v1477_v9  ;;  %v3622_v26 = vadd.f32 %v1966_v38, %v1478_v18  ;;  %v3624_v30 = vadd.f32 %v1966_v38, %v1479_v10 }
 0x283   : > { %v3626_v43 = vadd.f32 %v1966_v38, %v1480_v41  ;;  %v3628_v0 = vadd.f32 %v1966_v38, %v1481_v11  ;;  %v3630_v32 = vadd.f32 %v1966_v38, %v1482_v3  ;;  %v3632_v60 = vadd.f32 %v1966_v38, %v1483_v42 }
 0x284   : > { %v3634_v52 = vadd.f32 %v1966_v38, %v1484_v28  ;;  %v3636_v24 = vadd.f32 %v1966_v38, %v1485_v54  ;;  %v3638_v37 = vadd.f32 %v1966_v38, %v1486_v29  ;;  %v1511_v49 = vadd.f32 3.0, %v3610_v27 }
 0x285   : > { %v1512_v62 = vadd.f32 3.0, %v3612_v14  ;;  %v1513_v31 = vadd.f32 3.0, %v3614_v50  ;;  %v3643_v56 = vadd.f32 %v1966_v38, %v1487_v55  ;;  %v1514_v59 = vadd.f32 3.0, %v3616_v17 }
 0x286   : > { %v1515_v1 = vadd.f32 3.0, %v3618_v36  ;;  %v1516_v8 = vadd.f32 3.0, %v3620_v40  ;;  %v1517_v21 = vadd.f32 3.0, %v3622_v26  ;;  %v1518_v25 = vadd.f32 3.0, %v3624_v30 }
 0x287   : > { %v1519_v2 = vadd.f32 3.0, %v3626_v43  ;;  %v1520_v48 = vadd.f32 3.0, %v3628_v0  ;;  %v1521_v44 = vadd.f32 3.0, %v3630_v32  ;;  %v1522_v63 = vadd.f32 3.0, %v3632_v60 }
 0x288   : > { %v1523_v61 = vadd.f32 3.0, %v3634_v52  ;;  %v1524_v20 = vadd.f32 3.0, %v3636_v24  ;;  %v1525_v19 = vadd.f32 3.0, %v3638_v37  ;;  %v1527_v4 = vmax.f32 %v1511_v49, 0.0 }
 0x289   : > { %v1528_v51 = vmax.f32 %v1512_v62, 0.0  ;;  %v1529_v15 = vmax.f32 %v1513_v31, 0.0  ;;  %v1526_v33 = vadd.f32 3.0, %v3643_v56  ;;  %v1530_v34 = vmax.f32 %v1514_v59, 0.0 }
 0x28a   : > { %v1531_v46 = vmax.f32 %v1515_v1, 0.0  ;;  %v1532_v22 = vmax.f32 %v1516_v8, 0.0  ;;  %v1533_v35 = vmax.f32 %v1517_v21, 0.0  ;;  %v1534_v23 = vmax.f32 %v1518_v25, 0.0 }
 0x28b   : > { %v1535_v16 = vmax.f32 %v1519_v2, 0.0  ;;  %v1536_v58 = vmax.f32 %v1520_v48, 0.0  ;;  %v1537_v45 = vmax.f32 %v1521_v44, 0.0  ;;  %v1538_v39 = vmax.f32 %v1522_v63, 0.0 }
 0x28c   : > { %v1539_v47 = vmax.f32 %v1523_v61, 0.0  ;;  %v1540_v12 = vmax.f32 %v1524_v20, 0.0  ;;  %v1541_v57 = vmax.f32 %v1525_v19, 0.0  ;;  %v1543_v53 = vmin.f32 %v1527_v4, 6.0 }
 0x28d   : > { %v1544_v5 = vmin.f32 %v1528_v51, 6.0  ;;  %v1545_v13 = vmin.f32 %v1529_v15, 6.0  ;;  %v1542_v6 = vmax.f32 %v1526_v33, 0.0  ;;  %v1546_v7 = vmin.f32 %v1530_v34, 6.0 }
 0x28e   : > { %v1547_v9 = vmin.f32 %v1531_v46, 6.0  ;;  %v1548_v38 = vmin.f32 %v1532_v22, 6.0  ;;  %v1549_v18 = vmin.f32 %v1533_v35, 6.0  ;;  %v1550_v10 = vmin.f32 %v1534_v23, 6.0 }
 0x28f   : > { %v1551_v41 = vmin.f32 %v1535_v16, 6.0  ;;  %v1552_v11 = vmin.f32 %v1536_v58, 6.0  ;;  %v1553_v3 = vmin.f32 %v1537_v45, 6.0  ;;  %v1554_v42 = vmin.f32 %v1538_v39, 6.0 }
 0x290   : > { %v1555_v28 = vmin.f32 %v1539_v47, 6.0  ;;  %v1556_v54 = vmin.f32 %v1540_v12, 6.0  ;;  %v1557_v29 = vmin.f32 %v1541_v57, 6.0  ;;  %v1559_v55 = vmul.f32 %v1543_v53, %v3610_v27 }
 0x291   : > { %v1560_v49 = vmul.f32 %v1544_v5, %v3612_v14  ;;  %v1561_v62 = vmul.f32 %v1545_v13, %v3614_v50  ;;  %v1558_v31 = vmin.f32 %v1542_v6, 6.0  ;;  %v1562_v59 = vmul.f32 %v1546_v7, %v3616_v17 }
 0x292   : > { %v1563_v1 = vmul.f32 %v1547_v9, %v3618_v36  ;;  %v1564_v8 = vmul.f32 %v1548_v38, %v3620_v40  ;;  %v1565_v21 = vmul.f32 %v1549_v18, %v3622_v26  ;;  %v1566_v25 = vmul.f32 %v1550_v10, %v3624_v30 }
 0x293   : > { %v1567_v2 = vmul.f32 %v1551_v41, %v3626_v43  ;;  %v1568_v48 = vmul.f32 %v1552_v11, %v3628_v0  ;;  %v1569_v27 = vmul.f32 %v1553_v3, %v3630_v32  ;;  %v1570_v14 = vmul.f32 %v1554_v42, %v3632_v60 }
 0x294   : > { %v1571_v50 = vmul.f32 %v1555_v28, %v3634_v52  ;;  %v1572_v17 = vmul.f32 %v1556_v54, %v3636_v24  ;;  %v1573_v36 = vmul.f32 %v1557_v29, %v3638_v37  ;;  %v1575_v44 = vmul.f32 0.16666667, %v1559_v55 }
 0x295   : > { %v1576_v40 = vmul.f32 0.16666667, %v1560_v49  ;;  %v1577_v63 = vmul.f32 0.16666667, %v1561_v62  ;;  %v1574_v26 = vmul.f32 %v1558_v31, %v3643_v56  ;;  %v1578_v30 = vmul.f32 0.16666667, %v1562_v59 }
 0x296   : > { %v1579_v43 = vmul.f32 0.16666667, %v1563_v1  ;;  %v1580_v0 = vmul.f32 0.16666667, %v1564_v8  ;;  %v1581_v61 = vmul.f32 0.16666667, %v1565_v21 }
 0x297   : > { %v1582_v32 = vmul.f32 0.16666667, %v1566_v25  ;;  %v1583_v20 = vmul.f32 0.16666667, %v1567_v2  ;;  %v2013_v60 = vpack.c.bf16 %v1576_v40, %v1575_v44  ;;  %v1584_v52 = vmul.f32 0.16666667, %v1568_v48 }
 0x298   : > { %v1585_v19 = vmul.f32 0.16666667, %v1569_v27  ;;  %v1586_v24 = vmul.f32 0.16666667, %v1570_v14  ;;  %v2018_v37 = vpack.c.bf16 %v1578_v30, %v1577_v63  ;;  %v1587_v4 = vmul.f32 0.16666667, %v1571_v50 }
 0x299   : > { %v1588_v51 = vmul.f32 0.16666667, %v1572_v17  ;;  %v1589_v56 = vmul.f32 0.16666667, %v1573_v36  ;;  %2014 = vst [vmem:[%s3239_s9] sm:$0xff] %v2013_v60   ;;  %v2023_v15 = vpack.c.bf16 %v1580_v0, %v1579_v43  ;;  %v1590_v33 = vmul.f32 0.16666667, %v1574_v26 }
 0x29a   : > { %2050 = vst [vmem:[%s3239_s9 + $0x8] sm:$0xff] %v2018_v37   ;;  %v2028_v34 = vpack.c.bf16 %v1582_v32, %v1581_v61  ;;  %v2033_v46 = vpack.c.bf16 %v1584_v52, %v1583_v20  ;;  %v2038_v22 = vpack.c.bf16 %v1586_v24, %v1585_v19  ;;  %v1671_v23 = vadd.f32 %v1576_v40, %v1575_v44 }
 0x29b   : > { %2051 = vst [vmem:[%s3239_s9 + $0x10] sm:$0xff] %v2023_v15   ;;  %v2043_v35 = vpack.c.bf16 %v1588_v51, %v1587_v4  ;;  %v2048_v16 = vpack.c.bf16 %v1590_v33, %v1589_v56  ;;  %v2672_v54 = vmov (!%p1963_p6), 0.0  }
 0x29c   : > { %2052 = vst [vmem:[%s3239_s9 + $0x18] sm:$0xff] %v2028_v34   ;;  %2053 = vst [vmem:[%s3239_s9 + $0x20] sm:$0xff] %v2033_v46   ;;  %v1672_v58 = vadd.f32 %v1671_v23, %v1577_v63 }
 0x29d   : > { %2054 = vst [vmem:[%s3239_s9 + $0x28] sm:$0xff] %v2038_v22   ;;  %2055 = vst [vmem:[%s3239_s9 + $0x30] sm:$0xff] %v2043_v35  }
 0x29e   : > { %2056 = vst [vmem:[%s3239_s9 + $0x38] sm:$0xff] %v2048_v16   ;;  %v1673_v45 = vadd.f32 %v1672_v58, %v1578_v30  ;;  %1695 = vst [vmem:[%s3243_s10] sm:$0x1] (!%p1963_p6), %v2672_v54 }
 0x2a0   : > { %v1674_v39 = vadd.f32 %v1673_v45, %v1579_v43 }
 0x2a2   : > { %v1675_v47 = vadd.f32 %v1674_v39, %v1580_v0 }
 0x2a4   : > { %v1676_v12 = vadd.f32 %v1675_v47, %v1581_v61 }
 0x2a6   : > { %v1677_v57 = vadd.f32 %v1676_v12, %v1582_v32 }
 0x2a8   : > { %v1678_v53 = vadd.f32 %v1677_v57, %v1583_v20 }
 0x2aa   : > { %v1679_v5 = vadd.f32 %v1678_v53, %v1584_v52 }
 0x2ac   : > { %v1680_v13 = vadd.f32 %v1679_v5, %v1585_v19 }
 0x2ae   : > { %v1681_v6 = vadd.f32 %v1680_v13, %v1586_v24 }
 0x2b0   : > { %v1682_v7 = vadd.f32 %v1681_v6, %v1587_v4 }
 0x2b2   : > { %v1683_v9 = vadd.f32 %v1682_v7, %v1588_v51 }
 0x2b4   : > { %v1684_v38 = vadd.f32 %v1683_v9, %v1589_v56 }
 0x2b6   : > { %v1685_v18 = vadd.f32 %v1684_v38, %v1590_v33 }
 0x2b8   : > { %v1686_v10 = vrot.slane %v1685_v18, 4 }
 0x2ba   : > { %v1687_v41 = vadd.f32 %v1686_v10, %v1685_v18 }
 0x2bc   : > { %v1688_v11 = vrot.slane %v1687_v41, 2  ;;  %1694 = sbr.rel (%p1963_p6) target bundleno = 707 (0x2c3), region = 84 }
 0x2be   : > { %v1689_v3 = vadd.f32 %v1688_v11, %v1687_v41 }
 0x2c0   : > { %v1690_v42 = vrot.slane %v1689_v3, 1 }
 0x2c2   : > { %v1691_v28 = vadd.f32 %v1690_v42, %v1689_v3 }
 0x2c3 PF: > { %s4121_s14 = sld [smem:[#allocation29_spill]]  ;;  %s4122_s15 = sld [smem:[#allocation30_spill]]  ;;  %v1696_v29 = vld [vmem:[%s3243_s10] sm:$0x1] }
 0x2c4   : > { %s4123_s21 = sld [smem:[#allocation37_spill]]  ;;  %v1697_v55 = vadd.f32 %v1696_v29, %v1691_v28  ;;  %s1720_s30 = sshll.u32 %s3239_s9, 4  ;;  %s3689_s30 = int_to_ptr.vmem [resolvable:$true] %s1720_s30 }
 0x2c5   : > { %s4124_s11 = sld [smem:[#allocation89_spill]]  ;;  %s3699_s19 = scalar_lea.sflag [#allocation5], %s465_s5 }
 0x2c6   : > { %1698 = vst [vmem:[%s3243_s10] sm:$0x1] %v1697_v55  ;;  %s2447_s18 = scalar_lea.vmem %s3689_s30, 1024  ;;  %s2673_s9 = smov [#allocation11]  }
 0x2c7   : > { %p2448_p4 = scmp.ne.s32.totalorder %s3689_s30, %s2447_s18  ;;  %s2451_s26 = sshll.u32 %s2673_s9, 4  ;;  %s2452_s26 = int_to_ptr.vmem [resolvable:$false] %s2451_s26 }
 0x2c8   : > { %s2453_s17 = scalar_lea.vmem %s2452_s26, 2048  ;;  %p2454_p2 = scmp.lt.s32.totalorder %s3689_s30, %s2452_s26 }
 0x2c9   : > { %s2009_s1 = sshll.u32 %s4121_s14, 4  ;;  %s1987_s27 = sshll.u32 %s4122_s15, 5 }
 0x2ca   : > { %s1717_s25 = sadd.s32 %s2009_s1, %s1987_s27  ;;  %p4125_p9 = scmp.ne.s32.totalorder %s4123_s21, 0 }
 0x2cb   : > { %s1988_s28 = sshll.u32 %s1717_s25, 6  ;;  %p2455_p3 = scmp.lt.s32.totalorder %s2453_s17, %s2447_s18 }
 0x2cc   : > { %s3695_s16 = scalar_lea.hbm %s4124_s11, %s1988_s28  ;;  %p2449_p1 = pnand %p2448_p4, %p4125_p9 }
 0x2cd   : > { %p2456_p7 = por %p2455_p3, %p2454_p2 }
 0x2ce   : > { %p2450_p11 = pneg %p2449_p1 }
 0x2d0   : > { %p2457_p8 = pnand %p2456_p7, %p2450_p11 }
 0x2d2   : > { %2460 = shalt.err (!%p2457_p8)
}
 0x2d3   : > { %s2461_s5 = scalar_lea.hbm %s3695_s16, 1024  ;;  %s2465_s14 = scalar_lea.hbm %s4124_s11, 4096 }
 0x2d4   : > { %p2462_p10 = scmp.ne.s32.totalorder %s3695_s16, %s2461_s5  ;;  %p2466_p0 = scmp.lt.u32.totalorder %s3695_s16, %s4124_s11 }
 0x2d5   : > { %p2467_p6 = scmp.lt.u32.totalorder %s2465_s14, %s2461_s5  ;;  %p2469_p4 = scmp.lt.u32.totalorder %s2461_s5, %s3695_s16 }
 0x2d6   : > { %p2463_p13 = pnand %p2462_p10, %p4125_p9 }
 0x2d7   : > { %p2468_p5 = por %p2467_p6, %p2466_p0 }
 0x2d8   : > { %p2464_p12 = pneg %p2463_p13 }
 0x2d9   : > { %p2470_p1 = por %p2469_p4, %p2468_p5 }
 0x2db   : > { %p2471_p11 = pnand %p2470_p1, %p2464_p12 }
 0x2dd   : > { %2474 = shalt.err (!%p2471_p11)
}
 0x2de   : > { %s2674_s25 = smov 64   ;;  %s4127_s22 = sld [smem:[#allocation39_spill]] }
 0x2df   : > { %s2675_s6 = smov 4   ;;  %s1989_s18 = sshll.u32 %s4122_s15, 4 }
 0x2e0   : > { %2137 = dma.vmem_to_hbm [thread:$0]  (%p4125_p9), %s3689_s30, 1024, %s3695_s16, %s3699_s19, %s2674_s25, %s2674_s25, %s2675_s6  }
 0x2e1   : > { %s4128_s17 = sld [smem:[#allocation90_spill]]  ;;  %s1736_s13 = sshll.u32 %s3243_s10, 4  ;;  %s1737_s13 = int_to_ptr.vmem [resolvable:$true] %s1736_s13 }
 0x2e2   : > { %s1705_s14 = scalar_lea.sflag [#allocation13], %s529_s2  ;;  %s2475_s1 = scalar_lea.vmem %s1737_s13, 16 }
 0x2e3   : > { %p2476_p2 = scmp.ne.s32.totalorder %s1737_s13, %s2475_s1  ;;  %s2676_s27 = smov [#allocation12]  }
 0x2e4   : > { %p4130_p3 = scmp.ne.s32.totalorder %s4127_s22, 0  ;;  %s2479_s3 = sshll.u32 %s2676_s27, 4  ;;  %s2480_s3 = int_to_ptr.vmem [resolvable:$false] %s2479_s3 }
 0x2e5   : > { %s2481_s21 = scalar_lea.vmem %s2480_s3, 32  ;;  %p2482_p9 = scmp.lt.s32.totalorder %s1737_s13, %s2480_s3 }
 0x2e6   : > { %p2477_p7 = pnand %p2476_p2, %p4130_p3  ;;  %p2483_p10 = scmp.lt.s32.totalorder %s2481_s21, %s2475_s1 }
 0x2e7   : > { %s4129_s4 = smov %s4128_s17  ;;  %s3727_s5 = scalar_lea.hbm %s4128_s17, %s1989_s18 }
 0x2e8   : > { %p2478_p8 = pneg %p2477_p7  ;;  %p2484_p13 = por %p2483_p10, %p2482_p9 }
 0x2ea   : > { %p2485_p12 = pnand %p2484_p13, %p2478_p8 }
 0x2ec   : > { %2488 = shalt.err (!%p2485_p12)
}
 0x2ed   : > { %s2489_s2 = scalar_lea.hbm %s3727_s5, 16  ;;  %s2493_s30 = scalar_lea.hbm %s4129_s4, 32 }
 0x2ee   : > { %p2490_p0 = scmp.ne.s32.totalorder %s3727_s5, %s2489_s2  ;;  %p2494_p4 = scmp.lt.u32.totalorder %s3727_s5, %s4129_s4 }
 0x2ef   : > { %p2495_p1 = scmp.lt.u32.totalorder %s2493_s30, %s2489_s2  ;;  %p2497_p2 = scmp.lt.u32.totalorder %s2489_s2, %s3727_s5 }
 0x2f0   : > { %p2491_p6 = pnand %p2490_p0, %p4130_p3 }
 0x2f1   : > { %p2496_p11 = por %p2495_p1, %p2494_p4 }
 0x2f2   : > { %p2492_p5 = pneg %p2491_p6 }
 0x2f3   : > { %p2498_p7 = por %p2497_p2, %p2496_p11 }
 0x2f5   : > { %p2499_p8 = pnand %p2498_p7, %p2492_p5 }
 0x2f7   : > { %2502 = shalt.err (!%p2499_p8)
}
 0x2f8   : > { %2138 = dma.vmem_to_hbm [thread:$0]  (%p4130_p3), %s1737_s13, 16, %s3727_s5, %s1705_s14  }
 0x2f9 PF: > { %s4131_s19 = sld [smem:[#allocation26_spill]]  ;;  %s4132_s25 = sld [smem:[#allocation35_spill]] }
 0x2fa   : > { %p2165_p9 = scmp.ge.s32.totalorder %s2661_s29, 2 }
 0x2ff   : > { %s1748_s28 = sand.u32 1, %s4131_s19   ;;  %p4133_p10 = scmp.ne.s32.totalorder %s4132_s25, 0 }
 0x300   : > { %s1749_s6 = scalar_lea.sflag [#allocation5], %s1748_s28 }
 0x301   : > { %p2156_p13 = pnand %p2165_p9, %p4133_p10 }
 0x303   : > { %2588 = dma.done.wait (!%p2156_p13), %s1749_s6, 1024  }
 0x304   : > { %2590 = vsyncadd (!%p2156_p13), %s1749_s6, 4294966272  ;;  %s4134_s18 = sld [smem:[#allocation20_spill]]  ;;  %s4135_s9 = sld [smem:[#allocation40_spill]] }
 0x30a   : > { %s1757_s26 = sand.u32 1, %s4134_s18   ;;  %p4136_p12 = scmp.ne.s32.totalorder %s4135_s9, 0 }
 0x30b   : > { %s1758_s17 = scalar_lea.sflag [#allocation13], %s1757_s26 }
 0x30c   : > { %p2159_p0 = pnand %p2165_p9, %p4136_p12 }
 0x30e   : > { %2592 = dma.done.wait (!%p2159_p0), %s1758_s17, 16  }
 0x30f   : > { %2594 = vsyncadd (!%p2159_p0), %s1758_s17, 4294967280  ;;  %s34_s29 = sadd.s32 1, %s2661_s29   ;;  %s4138_s13 = sld [smem:[#allocation21_spill]] }
 0x310   : > { %p3757_p3 = scmp.ge.s32.totalorder %s34_s29, 6   ;;  %s4139_s14 = sld [smem:[#allocation22_spill]] }
 0x311   : > { %s4140_s15 = sld [smem:[#allocation38_spill]]  ;;  %s4142_s17 = sld [smem:[#allocation25_spill]] }
 0x312   : > { %s4141_s16 = sld [smem:[#allocation24_spill]]  ;;  %s4143_s5 = sld [smem:[#allocation27_spill]] }
 0x313   : > { %s4144_s21 = sld [smem:[#allocation36_spill]]  ;;  %s4145_s25 = sld [smem:[#allocation31_spill]] }
 0x314   : > { %s4146_s26 = sld [smem:[#allocation32_spill]]  ;;  %s4147_s27 = sld [smem:[#allocation33_spill]] }
 0x315   : > { %s4148_s28 = sld [smem:[#allocation34_spill]]  ;;  %s4150_s18 = smov %s4171_s0 }
 0x316   : > { %s4151_s19 = smov %s2625_s20  ;;  %s4153_s22 = smov %s2637_s23 }
 0x317   : > { %s4154_s23 = smov %s2641_s24  ;;  %s4155_s24 = smov %s3022_s8 }
 0x318   : > { %s4152_s20 = smov %s4143_s5  ;;  %33 = sbr.rel (!%p3757_p3) target bundleno = 29 (0x1d), region = 161 }
 0x31f   :  { %1762 = vsyncpa [#allocation4], 1 }
 0x320   :  { %1764 = vsyncpa [#allocation4 + $0x1], 1 }
 0x321   :  { %1765 = vsyncpa [#allocation7], 1 }
 0x322   :  { %1767 = vsyncpa [#allocation7 + $0x1], 1 }
 0x323   :  { %1768 = vsyncpa [#allocation10], 1 }
 0x324   :  { %1769 = vsyncpa [#allocation5], 1 }
 0x325   :  { %1771 = vsyncpa [#allocation5 + $0x1], 1 }
 0x326   :  { %1772 = vsyncpa [#allocation13], 1 }
 0x327   :  { %1774 = vsyncpa [#allocation13 + $0x1], 1 }

</bundles_post_ra>
